<compile_context>
chip_gen: v7x
topology: tpu7x:2x2x1
jax: 0.10.0
libtpu: 0.0.40
codegen_flags: <defaults>
</compile_context>

<pallas_src>
import jax
import jax.numpy as jnp
from jax.experimental import pallas as pl
from jax.experimental.pallas import tpu as pltpu


def _ceil(v):
    return int(v) if v == int(v) else int(v) + 1


def _total_bins(levels):
    return sum(i * i for i in range(1, levels + 1))


def _level_params(H, W, levels):
    """Static per-level pooling params, matching F.max_pool2d floor mode."""
    metas = []
    off = 0
    for i in range(1, levels + 1):
        nx, ny = _ceil(H / i), _ceil(W / i)          # kernel size
        sx, sy = H // i, W // i                      # stride
        if sx == 0 or sy == 0:
            # PyTorch F.max_pool2d would raise on stride 0 as well.
            raise ValueError(
                f"spp2d_layer: spatial dims ({H},{W}) must be >= levels={levels}")
        ox = (H - nx) // sx + 1                      # floor mode (PyTorch default)
        oy = (W - ny) // sy + 1
        metas.append(dict(i=i, nx=nx, ny=ny, sx=sx, sy=sy, ox=ox, oy=oy, off=off))
        off += ox * oy
    return metas, off


def _make_spp_kernel(H, W, metas, n_out):
    """Kernel over one (batch, channel-tile) block.

    x_ref:  (1, H, W, dt)    channels on lanes, spatial rows leading
    out_ref:(1, n_out, dt)   one lane-dense row per pyramid bin
    """
    by_i = {m["i"]: m for m in metas}
    # Levels that tile H,W exactly are eligible for nested reuse: a coarser
    # exact level is a pairwise max of a finer exact level that it divides.
    exact = {m["i"] for m in metas if H % m["i"] == 0 and W % m["i"] == 0}
    order = sorted(by_i, reverse=True)               # finest level first
    derive_src = {}
    available = set()
    for i in order:
        if i in exact:
            cands = [j for j in available if j > i and j % i == 0]
            if cands:
                derive_src[i] = min(cands)           # smallest ratio
            available.add(i)
    sources = set(derive_src.values())

    def kernel(x_ref, out_ref):

        def col_bins(band, m):
            """Column-window maxima of one row-band. band: (W, dt) -> list of (1, dt)."""
            oy, ny, sy = m["oy"], m["ny"], m["sy"]
            if oy == 1:
                # Single bin: one small cross-sublane reduce is fine.
                return [jnp.max(band[0:ny], axis=0, keepdims=True)]
            if W % 8 == 0:
                # All window maxima at once: (ny-1) XLU rolls + VPU maxima,
                # then pick the oy needed rows (no wraparound: c0 + ny <= W).
                win = band
                for k in range(1, ny):
                    win = jnp.maximum(win, pltpu.roll(band, W - k, axis=0))
                return [win[py * sy:py * sy + 1] for py in range(oy)]
            # Fallback for non-sublane-aligned W: pairwise maxima over rows.
            bins = []
            for py in range(oy):
                c0 = py * sy
                acc = band[c0:c0 + 1]
                for rr in range(1, ny):
                    acc = jnp.maximum(acc, band[c0 + rr:c0 + rr + 1])
                bins.append(acc)
            return bins

        def direct_block(m, need_px):
            """First need_px row-bands of a level, straight from VMEM rows."""
            row_blocks = []
            for px in range(need_px):
                r0 = px * m["sx"]
                band = x_ref[0, r0]                       # (W, dt), pure VPU maxima
                for rr in range(1, m["nx"]):
                    band = jnp.maximum(band, x_ref[0, r0 + rr])
                bins = col_bins(band, m)
                row_blocks.append(bins[0] if len(bins) == 1
                                  else jnp.concatenate(bins, axis=0))
            return (row_blocks[0] if len(row_blocks) == 1
                    else jnp.concatenate(row_blocks, axis=0))

        def derived_block(m, src_m, src_blk):
            """Coarser exact level as pairwise maxima of a finer exact level."""
            r = src_m["i"] // m["i"]
            row_blocks = []
            for px in range(m["ox"]):
                bins = []
                for py in range(m["oy"]):
                    acc = None
                    for a in range(r):
                        for c in range(r):
                            idx = (px * r + a) * src_m["oy"] + (py * r + c)
                            piece = src_blk[idx:idx + 1]
                            acc = piece if acc is None else jnp.maximum(acc, piece)
                    bins.append(acc)
                row_blocks.append(bins[0] if len(bins) == 1
                                  else jnp.concatenate(bins, axis=0))
            return (row_blocks[0] if len(row_blocks) == 1
                    else jnp.concatenate(row_blocks, axis=0))

        kept = {}   # source level -> its full (nb, dt) bin block (few vregs)
        for i in order:                                   # finest first
            m = by_i[i]
            nb = m["ox"] * m["oy"]
            off = m["off"]
            n_keep = max(0, min(nb, n_out - off))         # torch [:, :, :tbins]
            is_source = i in sources
            if n_keep == 0 and not is_source:
                continue
            if i in derive_src:
                src_m = by_i[derive_src[i]]
                blk = derived_block(m, src_m, kept[src_m["i"]])
            else:
                need_px = m["ox"] if is_source else -(-n_keep // m["oy"])
                blk = direct_block(m, need_px)
            if is_source:
                kept[i] = blk
            if n_keep > 0:
                # Grouped, lane-dense store for the whole level (emitted now so
                # non-source bins are not kept live until an epilogue).
                out_ref[0, off:off + n_keep, :] = blk[:n_keep].astype(out_ref.dtype)

    return kernel


def spp2d_layer(X, levels=5):
    """Pallas implementation of spp2D_layer.forward (NCHW input)."""
    b, d, H, W = X.shape
    tbins = _total_bins(levels)
    metas, total = _level_params(H, W, levels)
    n_out = min(total, tbins)                 # matches torch's out[:, :, :tbins]

    itemsize = jnp.dtype(X.dtype).itemsize

    # Channels-last so channels map to the 128-wide lane axis; padded to a
    # multiple of 128 for lane-dense traffic. allow_input_fusion lets XLA fuse
    # this transpose/pad into the pallas_call operand instead of an extra HBM pass.
    Xt = jnp.transpose(X, (0, 2, 3, 1))       # (b, H, W, d)
    d_pad = ((d + 127) // 128) * 128
    if d_pad != d:
        Xt = jnp.pad(Xt, ((0, 0), (0, 0), (0, 0), (0, d_pad - d)))

    # Generation-aware VMEM budget.
    try:
        vmem_cap = int(getattr(pltpu.get_tpu_info(), "vmem_capacity_bytes", 64 << 20))
    except Exception:
        vmem_cap = 64 << 20
    in_budget = min(vmem_cap, 64 << 20) // 8  # per double-buffered input tile

    # Channel tile: lane-dense, capped at 256 so bin blocks stay in vregs.
    d_tile = 128
    while (d_pad % (d_tile * 2) == 0 and d_tile * 2 <= 256
           and 2 * H * W * (d_tile * 2) * itemsize <= in_budget):
        d_tile *= 2
    n_d = d_pad // d_tile
    # Give dual-TensorCore chips (v7x) at least 2 grid programs when possible.
    while b * n_d < 2 and d_tile > 128:
        d_tile //= 2
        n_d = d_pad // d_tile

    in_step = H * W * d_tile * itemsize
    out_step = n_out * d_tile * itemsize
    vmem_limit = int(min(vmem_cap,
                         max(32 << 20, 3 * (2 * in_step + 2 * out_step) + (2 << 20))))

    kernel = _make_spp_kernel(H, W, metas, n_out)

    cost = pl.CostEstimate(
        flops=int(b * d_pad * H * W * levels),
        transcendentals=0,
        bytes_accessed=int(b * H * W * d_pad * itemsize
                           + b * n_out * d_pad * itemsize),
    )

    out = pl.pallas_call(
        kernel,
        out_shape=jax.ShapeDtypeStruct((b, n_out, d_pad), X.dtype),
        grid=(b, n_d),
        in_specs=[pl.BlockSpec((1, H, W, d_tile), lambda ib, ic: (ib, 0, 0, ic))],
        out_specs=pl.BlockSpec((1, n_out, d_tile), lambda ib, ic: (ib, 0, ic)),
        compiler_params=pltpu.CompilerParams(
            dimension_semantics=("parallel", "parallel"),
            vmem_limit_bytes=vmem_limit,
            allow_input_fusion=[True],
        ),
        cost_estimate=cost,
    )(Xt)

    # Drop padded channels, then (b, n_out, d) -> (b, d, n_out) -> (b, d*n_out),
    # matching torch's .view(b, d, -1) followed by .view(b, -1).
    out = out[:, :, :d]
    return jnp.transpose(out, (0, 2, 1)).reshape(b, d * n_out)


def _spp2d_reference(X, levels=5):
    """Pure-JAX reference mirroring F.max_pool2d (floor mode, no padding)."""
    b, d, H, W = X.shape
    tbins = _total_bins(levels)
    pooled = []
    for i in range(1, levels + 1):
        nx, ny = _ceil(H / i), _ceil(W / i)
        sx, sy = H // i, W // i
        ox = (H - nx) // sx + 1
        oy = (W - ny) // sy + 1
        for px in range(ox):
            for py in range(oy):
                win = X[:, :, px * sx:px * sx + nx, py * sy:py * sy + ny]
                pooled.append(jnp.max(win, axis=(2, 3))[..., None])  # (b, d, 1)
    out = jnp.concatenate(pooled, axis=-1)[:, :, :tbins]
    return out.reshape(b, -1)


if __name__ == "__main__":
    key = jax.random.PRNGKey(0)
    levels = 5  # spp2D_layer default

    cases = [
        ((2, 4, 16, 16), jnp.float32),    # small demo (channel-padding path, nested reuse)
        ((1, 256, 16, 16), jnp.float32),  # lane-dense channels, channel-tiled grid
        ((2, 4, 7, 7), jnp.float32),      # truncation (total bins > tbins), odd spatial
    ]
    for idx, (shape, dt) in enumerate(cases):
        k = jax.random.fold_in(key, idx)
        X = jax.random.normal(k, shape, dtype=dt)
        out = jax.block_until_ready(spp2d_layer(X, levels=levels))
        ref = _spp2d_reference(X, levels=levels)
        assert out.shape == ref.shape, (shape, out.shape, ref.shape)
        assert jnp.allclose(out, ref, atol=1e-6), f"mismatch vs reference for {shape}"

    print("KERNEL_OK")
</pallas_src>

<mosaic_0001>
module attributes {stable_mosaic.version = 11 : i64} {
  func.func @kernel(%arg0: i32, %arg1: i32, %arg2: memref<1x16x16x128xf32, #tpu.memory_space<vmem>>, %arg3: memref<1x55x128xf32, #tpu.memory_space<vmem>>) attributes {dimension_semantics = [#tpu.dimension_semantics<parallel>, #tpu.dimension_semantics<parallel>], iteration_bounds = array<i64: 2, 1>, scalar_prefetch = 0 : i64, scratch_operands = 0 : i64, tpu.core_type = #tpu.core_type<tc>, window_params = [{transform_indices = @transform_0, window_bounds = array<i64: 1, 16, 16, 128>}, {transform_indices = @transform_1, window_bounds = array<i64: 1, 55, 128>}]} {
    %c0 = arith.constant 0 : index
    %c0_0 = arith.constant 0 : index
    %c0_1 = arith.constant 0 : index
    %c0_2 = arith.constant 0 : index
    %0 = vector.load %arg2[%c0, %c0_0, %c0_1, %c0_2] : memref<1x16x16x128xf32, #tpu.memory_space<vmem>>, vector<1x1x16x128xf32>
    %1 = vector.shape_cast %0 : vector<1x1x16x128xf32> to vector<16x128xf32>
    %c0_3 = arith.constant 0 : index
    %c1 = arith.constant 1 : index
    %c0_4 = arith.constant 0 : index
    %c0_5 = arith.constant 0 : index
    %2 = vector.load %arg2[%c0_3, %c1, %c0_4, %c0_5] : memref<1x16x16x128xf32, #tpu.memory_space<vmem>>, vector<1x1x16x128xf32>
    %3 = vector.shape_cast %2 : vector<1x1x16x128xf32> to vector<16x128xf32>
    %4 = arith.maximumf %1, %3 : vector<16x128xf32>
    %c0_6 = arith.constant 0 : index
    %c2 = arith.constant 2 : index
    %c0_7 = arith.constant 0 : index
    %c0_8 = arith.constant 0 : index
    %5 = vector.load %arg2[%c0_6, %c2, %c0_7, %c0_8] : memref<1x16x16x128xf32, #tpu.memory_space<vmem>>, vector<1x1x16x128xf32>
    %6 = vector.shape_cast %5 : vector<1x1x16x128xf32> to vector<16x128xf32>
    %7 = arith.maximumf %4, %6 : vector<16x128xf32>
    %c0_9 = arith.constant 0 : index
    %c3 = arith.constant 3 : index
    %c0_10 = arith.constant 0 : index
    %c0_11 = arith.constant 0 : index
    %8 = vector.load %arg2[%c0_9, %c3, %c0_10, %c0_11] : memref<1x16x16x128xf32, #tpu.memory_space<vmem>>, vector<1x1x16x128xf32>
    %9 = vector.shape_cast %8 : vector<1x1x16x128xf32> to vector<16x128xf32>
    %10 = arith.maximumf %7, %9 : vector<16x128xf32>
    %c15_i32 = arith.constant 15 : i32
    %11 = tpu.dynamic_rotate %10 by %c15_i32 dim 0 : vector<16x128xf32>, i32 -> vector<16x128xf32>
    %12 = arith.maximumf %10, %11 : vector<16x128xf32>
    %c14_i32 = arith.constant 14 : i32
    %13 = tpu.dynamic_rotate %10 by %c14_i32 dim 0 : vector<16x128xf32>, i32 -> vector<16x128xf32>
    %14 = arith.maximumf %12, %13 : vector<16x128xf32>
    %c13_i32 = arith.constant 13 : i32
    %15 = tpu.dynamic_rotate %10 by %c13_i32 dim 0 : vector<16x128xf32>, i32 -> vector<16x128xf32>
    %16 = arith.maximumf %14, %15 : vector<16x128xf32>
    %17 = vector.extract_strided_slice %16 {offsets = [0, 0], sizes = [1, 128], strides = [1, 1]} : vector<16x128xf32> to vector<1x128xf32>
    %18 = vector.extract_strided_slice %16 {offsets = [3, 0], sizes = [1, 128], strides = [1, 1]} : vector<16x128xf32> to vector<1x128xf32>
    %19 = vector.extract_strided_slice %16 {offsets = [6, 0], sizes = [1, 128], strides = [1, 1]} : vector<16x128xf32> to vector<1x128xf32>
    %20 = vector.extract_strided_slice %16 {offsets = [9, 0], sizes = [1, 128], strides = [1, 1]} : vector<16x128xf32> to vector<1x128xf32>
    %21 = vector.extract_strided_slice %16 {offsets = [12, 0], sizes = [1, 128], strides = [1, 1]} : vector<16x128xf32> to vector<1x128xf32>
    %22 = tpu.concatenate %17, %18, %19, %20, %21 in 0 : vector<1x128xf32>, vector<1x128xf32>, vector<1x128xf32>, vector<1x128xf32>, vector<1x128xf32> -> vector<5x128xf32>
    %c0_12 = arith.constant 0 : index
    %c3_13 = arith.constant 3 : index
    %c0_14 = arith.constant 0 : index
    %c0_15 = arith.constant 0 : index
    %23 = vector.load %arg2[%c0_12, %c3_13, %c0_14, %c0_15] : memref<1x16x16x128xf32, #tpu.memory_space<vmem>>, vector<1x1x16x128xf32>
    %24 = vector.shape_cast %23 : vector<1x1x16x128xf32> to vector<16x128xf32>
    %c0_16 = arith.constant 0 : index
    %c4 = arith.constant 4 : index
    %c0_17 = arith.constant 0 : index
    %c0_18 = arith.constant 0 : index
    %25 = vector.load %arg2[%c0_16, %c4, %c0_17, %c0_18] : memref<1x16x16x128xf32, #tpu.memory_space<vmem>>, vector<1x1x16x128xf32>
    %26 = vector.shape_cast %25 : vector<1x1x16x128xf32> to vector<16x128xf32>
    %27 = arith.maximumf %24, %26 : vector<16x128xf32>
    %c0_19 = arith.constant 0 : index
    %c5 = arith.constant 5 : index
    %c0_20 = arith.constant 0 : index
    %c0_21 = arith.constant 0 : index
    %28 = vector.load %arg2[%c0_19, %c5, %c0_20, %c0_21] : memref<1x16x16x128xf32, #tpu.memory_space<vmem>>, vector<1x1x16x128xf32>
    %29 = vector.shape_cast %28 : vector<1x1x16x128xf32> to vector<16x128xf32>
    %30 = arith.maximumf %27, %29 : vector<16x128xf32>
    %c0_22 = arith.constant 0 : index
    %c6 = arith.constant 6 : index
    %c0_23 = arith.constant 0 : index
    %c0_24 = arith.constant 0 : index
    %31 = vector.load %arg2[%c0_22, %c6, %c0_23, %c0_24] : memref<1x16x16x128xf32, #tpu.memory_space<vmem>>, vector<1x1x16x128xf32>
    %32 = vector.shape_cast %31 : vector<1x1x16x128xf32> to vector<16x128xf32>
    %33 = arith.maximumf %30, %32 : vector<16x128xf32>
    %c15_i32_25 = arith.constant 15 : i32
    %34 = tpu.dynamic_rotate %33 by %c15_i32_25 dim 0 : vector<16x128xf32>, i32 -> vector<16x128xf32>
    %35 = arith.maximumf %33, %34 : vector<16x128xf32>
    %c14_i32_26 = arith.constant 14 : i32
    %36 = tpu.dynamic_rotate %33 by %c14_i32_26 dim 0 : vector<16x128xf32>, i32 -> vector<16x128xf32>
    %37 = arith.maximumf %35, %36 : vector<16x128xf32>
    %c13_i32_27 = arith.constant 13 : i32
    %38 = tpu.dynamic_rotate %33 by %c13_i32_27 dim 0 : vector<16x128xf32>, i32 -> vector<16x128xf32>
    %39 = arith.maximumf %37, %38 : vector<16x128xf32>
    %40 = vector.extract_strided_slice %39 {offsets = [0, 0], sizes = [1, 128], strides = [1, 1]} : vector<16x128xf32> to vector<1x128xf32>
    %41 = vector.extract_strided_slice %39 {offsets = [3, 0], sizes = [1, 128], strides = [1, 1]} : vector<16x128xf32> to vector<1x128xf32>
    %42 = vector.extract_strided_slice %39 {offsets = [6, 0], sizes = [1, 128], strides = [1, 1]} : vector<16x128xf32> to vector<1x128xf32>
    %43 = vector.extract_strided_slice %39 {offsets = [9, 0], sizes = [1, 128], strides = [1, 1]} : vector<16x128xf32> to vector<1x128xf32>
    %44 = vector.extract_strided_slice %39 {offsets = [12, 0], sizes = [1, 128], strides = [1, 1]} : vector<16x128xf32> to vector<1x128xf32>
    %45 = tpu.concatenate %40, %41, %42, %43, %44 in 0 : vector<1x128xf32>, vector<1x128xf32>, vector<1x128xf32>, vector<1x128xf32>, vector<1x128xf32> -> vector<5x128xf32>
    %c0_28 = arith.constant 0 : index
    %c6_29 = arith.constant 6 : index
    %c0_30 = arith.constant 0 : index
    %c0_31 = arith.constant 0 : index
    %46 = vector.load %arg2[%c0_28, %c6_29, %c0_30, %c0_31] : memref<1x16x16x128xf32, #tpu.memory_space<vmem>>, vector<1x1x16x128xf32>
    %47 = vector.shape_cast %46 : vector<1x1x16x128xf32> to vector<16x128xf32>
    %c0_32 = arith.constant 0 : index
    %c7 = arith.constant 7 : index
    %c0_33 = arith.constant 0 : index
    %c0_34 = arith.constant 0 : index
    %48 = vector.load %arg2[%c0_32, %c7, %c0_33, %c0_34] : memref<1x16x16x128xf32, #tpu.memory_space<vmem>>, vector<1x1x16x128xf32>
    %49 = vector.shape_cast %48 : vector<1x1x16x128xf32> to vector<16x128xf32>
    %50 = arith.maximumf %47, %49 : vector<16x128xf32>
    %c0_35 = arith.constant 0 : index
    %c8 = arith.constant 8 : index
    %c0_36 = arith.constant 0 : index
    %c0_37 = arith.constant 0 : index
    %51 = vector.load %arg2[%c0_35, %c8, %c0_36, %c0_37] : memref<1x16x16x128xf32, #tpu.memory_space<vmem>>, vector<1x1x16x128xf32>
    %52 = vector.shape_cast %51 : vector<1x1x16x128xf32> to vector<16x128xf32>
    %53 = arith.maximumf %50, %52 : vector<16x128xf32>
    %c0_38 = arith.constant 0 : index
    %c9 = arith.constant 9 : index
    %c0_39 = arith.constant 0 : index
    %c0_40 = arith.constant 0 : index
    %54 = vector.load %arg2[%c0_38, %c9, %c0_39, %c0_40] : memref<1x16x16x128xf32, #tpu.memory_space<vmem>>, vector<1x1x16x128xf32>
    %55 = vector.shape_cast %54 : vector<1x1x16x128xf32> to vector<16x128xf32>
    %56 = arith.maximumf %53, %55 : vector<16x128xf32>
    %c15_i32_41 = arith.constant 15 : i32
    %57 = tpu.dynamic_rotate %56 by %c15_i32_41 dim 0 : vector<16x128xf32>, i32 -> vector<16x128xf32>
    %58 = arith.maximumf %56, %57 : vector<16x128xf32>
    %c14_i32_42 = arith.constant 14 : i32
    %59 = tpu.dynamic_rotate %56 by %c14_i32_42 dim 0 : vector<16x128xf32>, i32 -> vector<16x128xf32>
    %60 = arith.maximumf %58, %59 : vector<16x128xf32>
    %c13_i32_43 = arith.constant 13 : i32
    %61 = tpu.dynamic_rotate %56 by %c13_i32_43 dim 0 : vector<16x128xf32>, i32 -> vector<16x128xf32>
    %62 = arith.maximumf %60, %61 : vector<16x128xf32>
    %63 = vector.extract_strided_slice %62 {offsets = [0, 0], sizes = [1, 128], strides = [1, 1]} : vector<16x128xf32> to vector<1x128xf32>
    %64 = vector.extract_strided_slice %62 {offsets = [3, 0], sizes = [1, 128], strides = [1, 1]} : vector<16x128xf32> to vector<1x128xf32>
    %65 = vector.extract_strided_slice %62 {offsets = [6, 0], sizes = [1, 128], strides = [1, 1]} : vector<16x128xf32> to vector<1x128xf32>
    %66 = vector.extract_strided_slice %62 {offsets = [9, 0], sizes = [1, 128], strides = [1, 1]} : vector<16x128xf32> to vector<1x128xf32>
    %67 = vector.extract_strided_slice %62 {offsets = [12, 0], sizes = [1, 128], strides = [1, 1]} : vector<16x128xf32> to vector<1x128xf32>
    %68 = tpu.concatenate %63, %64, %65, %66, %67 in 0 : vector<1x128xf32>, vector<1x128xf32>, vector<1x128xf32>, vector<1x128xf32>, vector<1x128xf32> -> vector<5x128xf32>
    %c0_44 = arith.constant 0 : index
    %c9_45 = arith.constant 9 : index
    %c0_46 = arith.constant 0 : index
    %c0_47 = arith.constant 0 : index
    %69 = vector.load %arg2[%c0_44, %c9_45, %c0_46, %c0_47] : memref<1x16x16x128xf32, #tpu.memory_space<vmem>>, vector<1x1x16x128xf32>
    %70 = vector.shape_cast %69 : vector<1x1x16x128xf32> to vector<16x128xf32>
    %c0_48 = arith.constant 0 : index
    %c10 = arith.constant 10 : index
    %c0_49 = arith.constant 0 : index
    %c0_50 = arith.constant 0 : index
    %71 = vector.load %arg2[%c0_48, %c10, %c0_49, %c0_50] : memref<1x16x16x128xf32, #tpu.memory_space<vmem>>, vector<1x1x16x128xf32>
    %72 = vector.shape_cast %71 : vector<1x1x16x128xf32> to vector<16x128xf32>
    %73 = arith.maximumf %70, %72 : vector<16x128xf32>
    %c0_51 = arith.constant 0 : index
    %c11 = arith.constant 11 : index
    %c0_52 = arith.constant 0 : index
    %c0_53 = arith.constant 0 : index
    %74 = vector.load %arg2[%c0_51, %c11, %c0_52, %c0_53] : memref<1x16x16x128xf32, #tpu.memory_space<vmem>>, vector<1x1x16x128xf32>
    %75 = vector.shape_cast %74 : vector<1x1x16x128xf32> to vector<16x128xf32>
    %76 = arith.maximumf %73, %75 : vector<16x128xf32>
    %c0_54 = arith.constant 0 : index
    %c12 = arith.constant 12 : index
    %c0_55 = arith.constant 0 : index
    %c0_56 = arith.constant 0 : index
    %77 = vector.load %arg2[%c0_54, %c12, %c0_55, %c0_56] : memref<1x16x16x128xf32, #tpu.memory_space<vmem>>, vector<1x1x16x128xf32>
    %78 = vector.shape_cast %77 : vector<1x1x16x128xf32> to vector<16x128xf32>
    %79 = arith.maximumf %76, %78 : vector<16x128xf32>
    %c15_i32_57 = arith.constant 15 : i32
    %80 = tpu.dynamic_rotate %79 by %c15_i32_57 dim 0 : vector<16x128xf32>, i32 -> vector<16x128xf32>
    %81 = arith.maximumf %79, %80 : vector<16x128xf32>
    %c14_i32_58 = arith.constant 14 : i32
    %82 = tpu.dynamic_rotate %79 by %c14_i32_58 dim 0 : vector<16x128xf32>, i32 -> vector<16x128xf32>
    %83 = arith.maximumf %81, %82 : vector<16x128xf32>
    %c13_i32_59 = arith.constant 13 : i32
    %84 = tpu.dynamic_rotate %79 by %c13_i32_59 dim 0 : vector<16x128xf32>, i32 -> vector<16x128xf32>
    %85 = arith.maximumf %83, %84 : vector<16x128xf32>
    %86 = vector.extract_strided_slice %85 {offsets = [0, 0], sizes = [1, 128], strides = [1, 1]} : vector<16x128xf32> to vector<1x128xf32>
    %87 = vector.extract_strided_slice %85 {offsets = [3, 0], sizes = [1, 128], strides = [1, 1]} : vector<16x128xf32> to vector<1x128xf32>
    %88 = vector.extract_strided_slice %85 {offsets = [6, 0], sizes = [1, 128], strides = [1, 1]} : vector<16x128xf32> to vector<1x128xf32>
    %89 = vector.extract_strided_slice %85 {offsets = [9, 0], sizes = [1, 128], strides = [1, 1]} : vector<16x128xf32> to vector<1x128xf32>
    %90 = vector.extract_strided_slice %85 {offsets = [12, 0], sizes = [1, 128], strides = [1, 1]} : vector<16x128xf32> to vector<1x128xf32>
    %91 = tpu.concatenate %86, %87, %88, %89, %90 in 0 : vector<1x128xf32>, vector<1x128xf32>, vector<1x128xf32>, vector<1x128xf32>, vector<1x128xf32> -> vector<5x128xf32>
    %c0_60 = arith.constant 0 : index
    %c12_61 = arith.constant 12 : index
    %c0_62 = arith.constant 0 : index
    %c0_63 = arith.constant 0 : index
    %92 = vector.load %arg2[%c0_60, %c12_61, %c0_62, %c0_63] : memref<1x16x16x128xf32, #tpu.memory_space<vmem>>, vector<1x1x16x128xf32>
    %93 = vector.shape_cast %92 : vector<1x1x16x128xf32> to vector<16x128xf32>
    %c0_64 = arith.constant 0 : index
    %c13 = arith.constant 13 : index
    %c0_65 = arith.constant 0 : index
    %c0_66 = arith.constant 0 : index
    %94 = vector.load %arg2[%c0_64, %c13, %c0_65, %c0_66] : memref<1x16x16x128xf32, #tpu.memory_space<vmem>>, vector<1x1x16x128xf32>
    %95 = vector.shape_cast %94 : vector<1x1x16x128xf32> to vector<16x128xf32>
    %96 = arith.maximumf %93, %95 : vector<16x128xf32>
    %c0_67 = arith.constant 0 : index
    %c14 = arith.constant 14 : index
    %c0_68 = arith.constant 0 : index
    %c0_69 = arith.constant 0 : index
    %97 = vector.load %arg2[%c0_67, %c14, %c0_68, %c0_69] : memref<1x16x16x128xf32, #tpu.memory_space<vmem>>, vector<1x1x16x128xf32>
    %98 = vector.shape_cast %97 : vector<1x1x16x128xf32> to vector<16x128xf32>
    %99 = arith.maximumf %96, %98 : vector<16x128xf32>
    %c0_70 = arith.constant 0 : index
    %c15 = arith.constant 15 : index
    %c0_71 = arith.constant 0 : index
    %c0_72 = arith.constant 0 : index
    %100 = vector.load %arg2[%c0_70, %c15, %c0_71, %c0_72] : memref<1x16x16x128xf32, #tpu.memory_space<vmem>>, vector<1x1x16x128xf32>
    %101 = vector.shape_cast %100 : vector<1x1x16x128xf32> to vector<16x128xf32>
    %102 = arith.maximumf %99, %101 : vector<16x128xf32>
    %c15_i32_73 = arith.constant 15 : i32
    %103 = tpu.dynamic_rotate %102 by %c15_i32_73 dim 0 : vector<16x128xf32>, i32 -> vector<16x128xf32>
    %104 = arith.maximumf %102, %103 : vector<16x128xf32>
    %c14_i32_74 = arith.constant 14 : i32
    %105 = tpu.dynamic_rotate %102 by %c14_i32_74 dim 0 : vector<16x128xf32>, i32 -> vector<16x128xf32>
    %106 = arith.maximumf %104, %105 : vector<16x128xf32>
    %c13_i32_75 = arith.constant 13 : i32
    %107 = tpu.dynamic_rotate %102 by %c13_i32_75 dim 0 : vector<16x128xf32>, i32 -> vector<16x128xf32>
    %108 = arith.maximumf %106, %107 : vector<16x128xf32>
    %109 = vector.extract_strided_slice %108 {offsets = [0, 0], sizes = [1, 128], strides = [1, 1]} : vector<16x128xf32> to vector<1x128xf32>
    %110 = vector.extract_strided_slice %108 {offsets = [3, 0], sizes = [1, 128], strides = [1, 1]} : vector<16x128xf32> to vector<1x128xf32>
    %111 = vector.extract_strided_slice %108 {offsets = [6, 0], sizes = [1, 128], strides = [1, 1]} : vector<16x128xf32> to vector<1x128xf32>
    %112 = vector.extract_strided_slice %108 {offsets = [9, 0], sizes = [1, 128], strides = [1, 1]} : vector<16x128xf32> to vector<1x128xf32>
    %113 = vector.extract_strided_slice %108 {offsets = [12, 0], sizes = [1, 128], strides = [1, 1]} : vector<16x128xf32> to vector<1x128xf32>
    %114 = tpu.concatenate %109, %110, %111, %112, %113 in 0 : vector<1x128xf32>, vector<1x128xf32>, vector<1x128xf32>, vector<1x128xf32>, vector<1x128xf32> -> vector<5x128xf32>
    %115 = tpu.concatenate %22, %45, %68, %91, %114 in 0 : vector<5x128xf32>, vector<5x128xf32>, vector<5x128xf32>, vector<5x128xf32>, vector<5x128xf32> -> vector<25x128xf32>
    %c0_76 = arith.constant 0 : index
    %c30 = arith.constant 30 : index
    %c0_77 = arith.constant 0 : index
    %116 = vector.load %arg3[%c0_76, %c30, %c0_77] : memref<1x55x128xf32, #tpu.memory_space<vmem>>, vector<1x25x128xf32>
    %117 = vector.shape_cast %116 : vector<1x25x128xf32> to vector<25x128xf32>
    %118 = vector.shape_cast %115 : vector<25x128xf32> to vector<1x25x128xf32>
    tpu.vector_store %arg3[%c0_76, %c30, %c0_77], %118 {strides = array<i32>} : memref<1x55x128xf32, #tpu.memory_space<vmem>>, vector<1x25x128xf32>,
    %c0_78 = arith.constant 0 : index
    %c0_79 = arith.constant 0 : index
    %c0_80 = arith.constant 0 : index
    %c0_81 = arith.constant 0 : index
    %119 = vector.load %arg2[%c0_78, %c0_79, %c0_80, %c0_81] : memref<1x16x16x128xf32, #tpu.memory_space<vmem>>, vector<1x1x16x128xf32>
    %120 = vector.shape_cast %119 : vector<1x1x16x128xf32> to vector<16x128xf32>
    %c0_82 = arith.constant 0 : index
    %c1_83 = arith.constant 1 : index
    %c0_84 = arith.constant 0 : index
    %c0_85 = arith.constant 0 : index
    %121 = vector.load %arg2[%c0_82, %c1_83, %c0_84, %c0_85] : memref<1x16x16x128xf32, #tpu.memory_space<vmem>>, vector<1x1x16x128xf32>
    %122 = vector.shape_cast %121 : vector<1x1x16x128xf32> to vector<16x128xf32>
    %123 = arith.maximumf %120, %122 : vector<16x128xf32>
    %c0_86 = arith.constant 0 : index
    %c2_87 = arith.constant 2 : index
    %c0_88 = arith.constant 0 : index
    %c0_89 = arith.constant 0 : index
    %124 = vector.load %arg2[%c0_86, %c2_87, %c0_88, %c0_89] : memref<1x16x16x128xf32, #tpu.memory_space<vmem>>, vector<1x1x16x128xf32>
    %125 = vector.shape_cast %124 : vector<1x1x16x128xf32> to vector<16x128xf32>
    %126 = arith.maximumf %123, %125 : vector<16x128xf32>
    %c0_90 = arith.constant 0 : index
    %c3_91 = arith.constant 3 : index
    %c0_92 = arith.constant 0 : index
    %c0_93 = arith.constant 0 : index
    %127 = vector.load %arg2[%c0_90, %c3_91, %c0_92, %c0_93] : memref<1x16x16x128xf32, #tpu.memory_space<vmem>>, vector<1x1x16x128xf32>
    %128 = vector.shape_cast %127 : vector<1x1x16x128xf32> to vector<16x128xf32>
    %129 = arith.maximumf %126, %128 : vector<16x128xf32>
    %c15_i32_94 = arith.constant 15 : i32
    %130 = tpu.dynamic_rotate %129 by %c15_i32_94 dim 0 : vector<16x128xf32>, i32 -> vector<16x128xf32>
    %131 = arith.maximumf %129, %130 : vector<16x128xf32>
    %c14_i32_95 = arith.constant 14 : i32
    %132 = tpu.dynamic_rotate %129 by %c14_i32_95 dim 0 : vector<16x128xf32>, i32 -> vector<16x128xf32>
    %133 = arith.maximumf %131, %132 : vector<16x128xf32>
    %c13_i32_96 = arith.constant 13 : i32
    %134 = tpu.dynamic_rotate %129 by %c13_i32_96 dim 0 : vector<16x128xf32>, i32 -> vector<16x128xf32>
    %135 = arith.maximumf %133, %134 : vector<16x128xf32>
    %136 = vector.extract_strided_slice %135 {offsets = [0, 0], sizes = [1, 128], strides = [1, 1]} : vector<16x128xf32> to vector<1x128xf32>
    %137 = vector.extract_strided_slice %135 {offsets = [4, 0], sizes = [1, 128], strides = [1, 1]} : vector<16x128xf32> to vector<1x128xf32>
    %138 = vector.extract_strided_slice %135 {offsets = [8, 0], sizes = [1, 128], strides = [1, 1]} : vector<16x128xf32> to vector<1x128xf32>
    %139 = vector.extract_strided_slice %135 {offsets = [12, 0], sizes = [1, 128], strides = [1, 1]} : vector<16x128xf32> to vector<1x128xf32>
    %140 = tpu.concatenate %136, %137, %138, %139 in 0 : vector<1x128xf32>, vector<1x128xf32>, vector<1x128xf32>, vector<1x128xf32> -> vector<4x128xf32>
    %c0_97 = arith.constant 0 : index
    %c4_98 = arith.constant 4 : index
    %c0_99 = arith.constant 0 : index
    %c0_100 = arith.constant 0 : index
    %141 = vector.load %arg2[%c0_97, %c4_98, %c0_99, %c0_100] : memref<1x16x16x128xf32, #tpu.memory_space<vmem>>, vector<1x1x16x128xf32>
    %142 = vector.shape_cast %141 : vector<1x1x16x128xf32> to vector<16x128xf32>
    %c0_101 = arith.constant 0 : index
    %c5_102 = arith.constant 5 : index
    %c0_103 = arith.constant 0 : index
    %c0_104 = arith.constant 0 : index
    %143 = vector.load %arg2[%c0_101, %c5_102, %c0_103, %c0_104] : memref<1x16x16x128xf32, #tpu.memory_space<vmem>>, vector<1x1x16x128xf32>
    %144 = vector.shape_cast %143 : vector<1x1x16x128xf32> to vector<16x128xf32>
    %145 = arith.maximumf %142, %144 : vector<16x128xf32>
    %c0_105 = arith.constant 0 : index
    %c6_106 = arith.constant 6 : index
    %c0_107 = arith.constant 0 : index
    %c0_108 = arith.constant 0 : index
    %146 = vector.load %arg2[%c0_105, %c6_106, %c0_107, %c0_108] : memref<1x16x16x128xf32, #tpu.memory_space<vmem>>, vector<1x1x16x128xf32>
    %147 = vector.shape_cast %146 : vector<1x1x16x128xf32> to vector<16x128xf32>
    %148 = arith.maximumf %145, %147 : vector<16x128xf32>
    %c0_109 = arith.constant 0 : index
    %c7_110 = arith.constant 7 : index
    %c0_111 = arith.constant 0 : index
    %c0_112 = arith.constant 0 : index
    %149 = vector.load %arg2[%c0_109, %c7_110, %c0_111, %c0_112] : memref<1x16x16x128xf32, #tpu.memory_space<vmem>>, vector<1x1x16x128xf32>
    %150 = vector.shape_cast %149 : vector<1x1x16x128xf32> to vector<16x128xf32>
    %151 = arith.maximumf %148, %150 : vector<16x128xf32>
    %c15_i32_113 = arith.constant 15 : i32
    %152 = tpu.dynamic_rotate %151 by %c15_i32_113 dim 0 : vector<16x128xf32>, i32 -> vector<16x128xf32>
    %153 = arith.maximumf %151, %152 : vector<16x128xf32>
    %c14_i32_114 = arith.constant 14 : i32
    %154 = tpu.dynamic_rotate %151 by %c14_i32_114 dim 0 : vector<16x128xf32>, i32 -> vector<16x128xf32>
    %155 = arith.maximumf %153, %154 : vector<16x128xf32>
    %c13_i32_115 = arith.constant 13 : i32
    %156 = tpu.dynamic_rotate %151 by %c13_i32_115 dim 0 : vector<16x128xf32>, i32 -> vector<16x128xf32>
    %157 = arith.maximumf %155, %156 : vector<16x128xf32>
    %158 = vector.extract_strided_slice %157 {offsets = [0, 0], sizes = [1, 128], strides = [1, 1]} : vector<16x128xf32> to vector<1x128xf32>
    %159 = vector.extract_strided_slice %157 {offsets = [4, 0], sizes = [1, 128], strides = [1, 1]} : vector<16x128xf32> to vector<1x128xf32>
    %160 = vector.extract_strided_slice %157 {offsets = [8, 0], sizes = [1, 128], strides = [1, 1]} : vector<16x128xf32> to vector<1x128xf32>
    %161 = vector.extract_strided_slice %157 {offsets = [12, 0], sizes = [1, 128], strides = [1, 1]} : vector<16x128xf32> to vector<1x128xf32>
    %162 = tpu.concatenate %158, %159, %160, %161 in 0 : vector<1x128xf32>, vector<1x128xf32>, vector<1x128xf32>, vector<1x128xf32> -> vector<4x128xf32>
    %c0_116 = arith.constant 0 : index
    %c8_117 = arith.constant 8 : index
    %c0_118 = arith.constant 0 : index
    %c0_119 = arith.constant 0 : index
    %163 = vector.load %arg2[%c0_116, %c8_117, %c0_118, %c0_119] : memref<1x16x16x128xf32, #tpu.memory_space<vmem>>, vector<1x1x16x128xf32>
    %164 = vector.shape_cast %163 : vector<1x1x16x128xf32> to vector<16x128xf32>
    %c0_120 = arith.constant 0 : index
    %c9_121 = arith.constant 9 : index
    %c0_122 = arith.constant 0 : index
    %c0_123 = arith.constant 0 : index
    %165 = vector.load %arg2[%c0_120, %c9_121, %c0_122, %c0_123] : memref<1x16x16x128xf32, #tpu.memory_space<vmem>>, vector<1x1x16x128xf32>
    %166 = vector.shape_cast %165 : vector<1x1x16x128xf32> to vector<16x128xf32>
    %167 = arith.maximumf %164, %166 : vector<16x128xf32>
    %c0_124 = arith.constant 0 : index
    %c10_125 = arith.constant 10 : index
    %c0_126 = arith.constant 0 : index
    %c0_127 = arith.constant 0 : index
    %168 = vector.load %arg2[%c0_124, %c10_125, %c0_126, %c0_127] : memref<1x16x16x128xf32, #tpu.memory_space<vmem>>, vector<1x1x16x128xf32>
    %169 = vector.shape_cast %168 : vector<1x1x16x128xf32> to vector<16x128xf32>
    %170 = arith.maximumf %167, %169 : vector<16x128xf32>
    %c0_128 = arith.constant 0 : index
    %c11_129 = arith.constant 11 : index
    %c0_130 = arith.constant 0 : index
    %c0_131 = arith.constant 0 : index
    %171 = vector.load %arg2[%c0_128, %c11_129, %c0_130, %c0_131] : memref<1x16x16x128xf32, #tpu.memory_space<vmem>>, vector<1x1x16x128xf32>
    %172 = vector.shape_cast %171 : vector<1x1x16x128xf32> to vector<16x128xf32>
    %173 = arith.maximumf %170, %172 : vector<16x128xf32>
    %c15_i32_132 = arith.constant 15 : i32
    %174 = tpu.dynamic_rotate %173 by %c15_i32_132 dim 0 : vector<16x128xf32>, i32 -> vector<16x128xf32>
    %175 = arith.maximumf %173, %174 : vector<16x128xf32>
    %c14_i32_133 = arith.constant 14 : i32
    %176 = tpu.dynamic_rotate %173 by %c14_i32_133 dim 0 : vector<16x128xf32>, i32 -> vector<16x128xf32>
    %177 = arith.maximumf %175, %176 : vector<16x128xf32>
    %c13_i32_134 = arith.constant 13 : i32
    %178 = tpu.dynamic_rotate %173 by %c13_i32_134 dim 0 : vector<16x128xf32>, i32 -> vector<16x128xf32>
    %179 = arith.maximumf %177, %178 : vector<16x128xf32>
    %180 = vector.extract_strided_slice %179 {offsets = [0, 0], sizes = [1, 128], strides = [1, 1]} : vector<16x128xf32> to vector<1x128xf32>
    %181 = vector.extract_strided_slice %179 {offsets = [4, 0], sizes = [1, 128], strides = [1, 1]} : vector<16x128xf32> to vector<1x128xf32>
    %182 = vector.extract_strided_slice %179 {offsets = [8, 0], sizes = [1, 128], strides = [1, 1]} : vector<16x128xf32> to vector<1x128xf32>
    %183 = vector.extract_strided_slice %179 {offsets = [12, 0], sizes = [1, 128], strides = [1, 1]} : vector<16x128xf32> to vector<1x128xf32>
    %184 = tpu.concatenate %180, %181, %182, %183 in 0 : vector<1x128xf32>, vector<1x128xf32>, vector<1x128xf32>, vector<1x128xf32> -> vector<4x128xf32>
    %c0_135 = arith.constant 0 : index
    %c12_136 = arith.constant 12 : index
    %c0_137 = arith.constant 0 : index
    %c0_138 = arith.constant 0 : index
    %185 = vector.load %arg2[%c0_135, %c12_136, %c0_137, %c0_138] : memref<1x16x16x128xf32, #tpu.memory_space<vmem>>, vector<1x1x16x128xf32>
    %186 = vector.shape_cast %185 : vector<1x1x16x128xf32> to vector<16x128xf32>
    %c0_139 = arith.constant 0 : index
    %c13_140 = arith.constant 13 : index
    %c0_141 = arith.constant 0 : index
    %c0_142 = arith.constant 0 : index
    %187 = vector.load %arg2[%c0_139, %c13_140, %c0_141, %c0_142] : memref<1x16x16x128xf32, #tpu.memory_space<vmem>>, vector<1x1x16x128xf32>
    %188 = vector.shape_cast %187 : vector<1x1x16x128xf32> to vector<16x128xf32>
    %189 = arith.maximumf %186, %188 : vector<16x128xf32>
    %c0_143 = arith.constant 0 : index
    %c14_144 = arith.constant 14 : index
    %c0_145 = arith.constant 0 : index
    %c0_146 = arith.constant 0 : index
    %190 = vector.load %arg2[%c0_143, %c14_144, %c0_145, %c0_146] : memref<1x16x16x128xf32, #tpu.memory_space<vmem>>, vector<1x1x16x128xf32>
    %191 = vector.shape_cast %190 : vector<1x1x16x128xf32> to vector<16x128xf32>
    %192 = arith.maximumf %189, %191 : vector<16x128xf32>
    %c0_147 = arith.constant 0 : index
    %c15_148 = arith.constant 15 : index
    %c0_149 = arith.constant 0 : index
    %c0_150 = arith.constant 0 : index
    %193 = vector.load %arg2[%c0_147, %c15_148, %c0_149, %c0_150] : memref<1x16x16x128xf32, #tpu.memory_space<vmem>>, vector<1x1x16x128xf32>
    %194 = vector.shape_cast %193 : vector<1x1x16x128xf32> to vector<16x128xf32>
    %195 = arith.maximumf %192, %194 : vector<16x128xf32>
    %c15_i32_151 = arith.constant 15 : i32
    %196 = tpu.dynamic_rotate %195 by %c15_i32_151 dim 0 : vector<16x128xf32>, i32 -> vector<16x128xf32>
    %197 = arith.maximumf %195, %196 : vector<16x128xf32>
    %c14_i32_152 = arith.constant 14 : i32
    %198 = tpu.dynamic_rotate %195 by %c14_i32_152 dim 0 : vector<16x128xf32>, i32 -> vector<16x128xf32>
    %199 = arith.maximumf %197, %198 : vector<16x128xf32>
    %c13_i32_153 = arith.constant 13 : i32
    %200 = tpu.dynamic_rotate %195 by %c13_i32_153 dim 0 : vector<16x128xf32>, i32 -> vector<16x128xf32>
    %201 = arith.maximumf %199, %200 : vector<16x128xf32>
    %202 = vector.extract_strided_slice %201 {offsets = [0, 0], sizes = [1, 128], strides = [1, 1]} : vector<16x128xf32> to vector<1x128xf32>
    %203 = vector.extract_strided_slice %201 {offsets = [4, 0], sizes = [1, 128], strides = [1, 1]} : vector<16x128xf32> to vector<1x128xf32>
    %204 = vector.extract_strided_slice %201 {offsets = [8, 0], sizes = [1, 128], strides = [1, 1]} : vector<16x128xf32> to vector<1x128xf32>
    %205 = vector.extract_strided_slice %201 {offsets = [12, 0], sizes = [1, 128], strides = [1, 1]} : vector<16x128xf32> to vector<1x128xf32>
    %206 = tpu.concatenate %202, %203, %204, %205 in 0 : vector<1x128xf32>, vector<1x128xf32>, vector<1x128xf32>, vector<1x128xf32> -> vector<4x128xf32>
    %207 = tpu.concatenate %140, %162, %184, %206 in 0 : vector<4x128xf32>, vector<4x128xf32>, vector<4x128xf32>, vector<4x128xf32> -> vector<16x128xf32>
    %c0_154 = arith.constant 0 : index
    %c14_155 = arith.constant 14 : index
    %c0_156 = arith.constant 0 : index
    %208 = vector.load %arg3[%c0_154, %c14_155, %c0_156] : memref<1x55x128xf32, #tpu.memory_space<vmem>>, vector<1x16x128xf32>
    %209 = vector.shape_cast %208 : vector<1x16x128xf32> to vector<16x128xf32>
    %210 = vector.shape_cast %207 : vector<16x128xf32> to vector<1x16x128xf32>
    tpu.vector_store %arg3[%c0_154, %c14_155, %c0_156], %210 {strides = array<i32>} : memref<1x55x128xf32, #tpu.memory_space<vmem>>, vector<1x16x128xf32>,
    %c0_157 = arith.constant 0 : index
    %c0_158 = arith.constant 0 : index
    %c0_159 = arith.constant 0 : index
    %c0_160 = arith.constant 0 : index
    %211 = vector.load %arg2[%c0_157, %c0_158, %c0_159, %c0_160] : memref<1x16x16x128xf32, #tpu.memory_space<vmem>>, vector<1x1x16x128xf32>
    %212 = vector.shape_cast %211 : vector<1x1x16x128xf32> to vector<16x128xf32>
    %c0_161 = arith.constant 0 : index
    %c1_162 = arith.constant 1 : index
    %c0_163 = arith.constant 0 : index
    %c0_164 = arith.constant 0 : index
    %213 = vector.load %arg2[%c0_161, %c1_162, %c0_163, %c0_164] : memref<1x16x16x128xf32, #tpu.memory_space<vmem>>, vector<1x1x16x128xf32>
    %214 = vector.shape_cast %213 : vector<1x1x16x128xf32> to vector<16x128xf32>
    %215 = arith.maximumf %212, %214 : vector<16x128xf32>
    %c0_165 = arith.constant 0 : index
    %c2_166 = arith.constant 2 : index
    %c0_167 = arith.constant 0 : index
    %c0_168 = arith.constant 0 : index
    %216 = vector.load %arg2[%c0_165, %c2_166, %c0_167, %c0_168] : memref<1x16x16x128xf32, #tpu.memory_space<vmem>>, vector<1x1x16x128xf32>
    %217 = vector.shape_cast %216 : vector<1x1x16x128xf32> to vector<16x128xf32>
    %218 = arith.maximumf %215, %217 : vector<16x128xf32>
    %c0_169 = arith.constant 0 : index
    %c3_170 = arith.constant 3 : index
    %c0_171 = arith.constant 0 : index
    %c0_172 = arith.constant 0 : index
    %219 = vector.load %arg2[%c0_169, %c3_170, %c0_171, %c0_172] : memref<1x16x16x128xf32, #tpu.memory_space<vmem>>, vector<1x1x16x128xf32>
    %220 = vector.shape_cast %219 : vector<1x1x16x128xf32> to vector<16x128xf32>
    %221 = arith.maximumf %218, %220 : vector<16x128xf32>
    %c0_173 = arith.constant 0 : index
    %c4_174 = arith.constant 4 : index
    %c0_175 = arith.constant 0 : index
    %c0_176 = arith.constant 0 : index
    %222 = vector.load %arg2[%c0_173, %c4_174, %c0_175, %c0_176] : memref<1x16x16x128xf32, #tpu.memory_space<vmem>>, vector<1x1x16x128xf32>
    %223 = vector.shape_cast %222 : vector<1x1x16x128xf32> to vector<16x128xf32>
    %224 = arith.maximumf %221, %223 : vector<16x128xf32>
    %c0_177 = arith.constant 0 : index
    %c5_178 = arith.constant 5 : index
    %c0_179 = arith.constant 0 : index
    %c0_180 = arith.constant 0 : index
    %225 = vector.load %arg2[%c0_177, %c5_178, %c0_179, %c0_180] : memref<1x16x16x128xf32, #tpu.memory_space<vmem>>, vector<1x1x16x128xf32>
    %226 = vector.shape_cast %225 : vector<1x1x16x128xf32> to vector<16x128xf32>
    %227 = arith.maximumf %224, %226 : vector<16x128xf32>
    %c15_i32_181 = arith.constant 15 : i32
    %228 = tpu.dynamic_rotate %227 by %c15_i32_181 dim 0 : vector<16x128xf32>, i32 -> vector<16x128xf32>
    %229 = arith.maximumf %227, %228 : vector<16x128xf32>
    %c14_i32_182 = arith.constant 14 : i32
    %230 = tpu.dynamic_rotate %227 by %c14_i32_182 dim 0 : vector<16x128xf32>, i32 -> vector<16x128xf32>
    %231 = arith.maximumf %229, %230 : vector<16x128xf32>
    %c13_i32_183 = arith.constant 13 : i32
    %232 = tpu.dynamic_rotate %227 by %c13_i32_183 dim 0 : vector<16x128xf32>, i32 -> vector<16x128xf32>
    %233 = arith.maximumf %231, %232 : vector<16x128xf32>
    %c12_i32 = arith.constant 12 : i32
    %234 = tpu.dynamic_rotate %227 by %c12_i32 dim 0 : vector<16x128xf32>, i32 -> vector<16x128xf32>
    %235 = arith.maximumf %233, %234 : vector<16x128xf32>
    %c11_i32 = arith.constant 11 : i32
    %236 = tpu.dynamic_rotate %227 by %c11_i32 dim 0 : vector<16x128xf32>, i32 -> vector<16x128xf32>
    %237 = arith.maximumf %235, %236 : vector<16x128xf32>
    %238 = vector.extract_strided_slice %237 {offsets = [0, 0], sizes = [1, 128], strides = [1, 1]} : vector<16x128xf32> to vector<1x128xf32>
    %239 = vector.extract_strided_slice %237 {offsets = [5, 0], sizes = [1, 128], strides = [1, 1]} : vector<16x128xf32> to vector<1x128xf32>
    %240 = vector.extract_strided_slice %237 {offsets = [10, 0], sizes = [1, 128], strides = [1, 1]} : vector<16x128xf32> to vector<1x128xf32>
    %241 = tpu.concatenate %238, %239, %240 in 0 : vector<1x128xf32>, vector<1x128xf32>, vector<1x128xf32> -> vector<3x128xf32>
    %c0_184 = arith.constant 0 : index
    %c5_185 = arith.constant 5 : index
    %c0_186 = arith.constant 0 : index
    %c0_187 = arith.constant 0 : index
    %242 = vector.load %arg2[%c0_184, %c5_185, %c0_186, %c0_187] : memref<1x16x16x128xf32, #tpu.memory_space<vmem>>, vector<1x1x16x128xf32>
    %243 = vector.shape_cast %242 : vector<1x1x16x128xf32> to vector<16x128xf32>
    %c0_188 = arith.constant 0 : index
    %c6_189 = arith.constant 6 : index
    %c0_190 = arith.constant 0 : index
    %c0_191 = arith.constant 0 : index
    %244 = vector.load %arg2[%c0_188, %c6_189, %c0_190, %c0_191] : memref<1x16x16x128xf32, #tpu.memory_space<vmem>>, vector<1x1x16x128xf32>
    %245 = vector.shape_cast %244 : vector<1x1x16x128xf32> to vector<16x128xf32>
    %246 = arith.maximumf %243, %245 : vector<16x128xf32>
    %c0_192 = arith.constant 0 : index
    %c7_193 = arith.constant 7 : index
    %c0_194 = arith.constant 0 : index
    %c0_195 = arith.constant 0 : index
    %247 = vector.load %arg2[%c0_192, %c7_193, %c0_194, %c0_195] : memref<1x16x16x128xf32, #tpu.memory_space<vmem>>, vector<1x1x16x128xf32>
    %248 = vector.shape_cast %247 : vector<1x1x16x128xf32> to vector<16x128xf32>
    %249 = arith.maximumf %246, %248 : vector<16x128xf32>
    %c0_196 = arith.constant 0 : index
    %c8_197 = arith.constant 8 : index
    %c0_198 = arith.constant 0 : index
    %c0_199 = arith.constant 0 : index
    %250 = vector.load %arg2[%c0_196, %c8_197, %c0_198, %c0_199] : memref<1x16x16x128xf32, #tpu.memory_space<vmem>>, vector<1x1x16x128xf32>
    %251 = vector.shape_cast %250 : vector<1x1x16x128xf32> to vector<16x128xf32>
    %252 = arith.maximumf %249, %251 : vector<16x128xf32>
    %c0_200 = arith.constant 0 : index
    %c9_201 = arith.constant 9 : index
    %c0_202 = arith.constant 0 : index
    %c0_203 = arith.constant 0 : index
    %253 = vector.load %arg2[%c0_200, %c9_201, %c0_202, %c0_203] : memref<1x16x16x128xf32, #tpu.memory_space<vmem>>, vector<1x1x16x128xf32>
    %254 = vector.shape_cast %253 : vector<1x1x16x128xf32> to vector<16x128xf32>
    %255 = arith.maximumf %252, %254 : vector<16x128xf32>
    %c0_204 = arith.constant 0 : index
    %c10_205 = arith.constant 10 : index
    %c0_206 = arith.constant 0 : index
    %c0_207 = arith.constant 0 : index
    %256 = vector.load %arg2[%c0_204, %c10_205, %c0_206, %c0_207] : memref<1x16x16x128xf32, #tpu.memory_space<vmem>>, vector<1x1x16x128xf32>
    %257 = vector.shape_cast %256 : vector<1x1x16x128xf32> to vector<16x128xf32>
    %258 = arith.maximumf %255, %257 : vector<16x128xf32>
    %c15_i32_208 = arith.constant 15 : i32
    %259 = tpu.dynamic_rotate %258 by %c15_i32_208 dim 0 : vector<16x128xf32>, i32 -> vector<16x128xf32>
    %260 = arith.maximumf %258, %259 : vector<16x128xf32>
    %c14_i32_209 = arith.constant 14 : i32
    %261 = tpu.dynamic_rotate %258 by %c14_i32_209 dim 0 : vector<16x128xf32>, i32 -> vector<16x128xf32>
    %262 = arith.maximumf %260, %261 : vector<16x128xf32>
    %c13_i32_210 = arith.constant 13 : i32
    %263 = tpu.dynamic_rotate %258 by %c13_i32_210 dim 0 : vector<16x128xf32>, i32 -> vector<16x128xf32>
    %264 = arith.maximumf %262, %263 : vector<16x128xf32>
    %c12_i32_211 = arith.constant 12 : i32
    %265 = tpu.dynamic_rotate %258 by %c12_i32_211 dim 0 : vector<16x128xf32>, i32 -> vector<16x128xf32>
    %266 = arith.maximumf %264, %265 : vector<16x128xf32>
    %c11_i32_212 = arith.constant 11 : i32
    %267 = tpu.dynamic_rotate %258 by %c11_i32_212 dim 0 : vector<16x128xf32>, i32 -> vector<16x128xf32>
    %268 = arith.maximumf %266, %267 : vector<16x128xf32>
    %269 = vector.extract_strided_slice %268 {offsets = [0, 0], sizes = [1, 128], strides = [1, 1]} : vector<16x128xf32> to vector<1x128xf32>
    %270 = vector.extract_strided_slice %268 {offsets = [5, 0], sizes = [1, 128], strides = [1, 1]} : vector<16x128xf32> to vector<1x128xf32>
    %271 = vector.extract_strided_slice %268 {offsets = [10, 0], sizes = [1, 128], strides = [1, 1]} : vector<16x128xf32> to vector<1x128xf32>
    %272 = tpu.concatenate %269, %270, %271 in 0 : vector<1x128xf32>, vector<1x128xf32>, vector<1x128xf32> -> vector<3x128xf32>
    %c0_213 = arith.constant 0 : index
    %c10_214 = arith.constant 10 : index
    %c0_215 = arith.constant 0 : index
    %c0_216 = arith.constant 0 : index
    %273 = vector.load %arg2[%c0_213, %c10_214, %c0_215, %c0_216] : memref<1x16x16x128xf32, #tpu.memory_space<vmem>>, vector<1x1x16x128xf32>
    %274 = vector.shape_cast %273 : vector<1x1x16x128xf32> to vector<16x128xf32>
    %c0_217 = arith.constant 0 : index
    %c11_218 = arith.constant 11 : index
    %c0_219 = arith.constant 0 : index
    %c0_220 = arith.constant 0 : index
    %275 = vector.load %arg2[%c0_217, %c11_218, %c0_219, %c0_220] : memref<1x16x16x128xf32, #tpu.memory_space<vmem>>, vector<1x1x16x128xf32>
    %276 = vector.shape_cast %275 : vector<1x1x16x128xf32> to vector<16x128xf32>
    %277 = arith.maximumf %274, %276 : vector<16x128xf32>
    %c0_221 = arith.constant 0 : index
    %c12_222 = arith.constant 12 : index
    %c0_223 = arith.constant 0 : index
    %c0_224 = arith.constant 0 : index
    %278 = vector.load %arg2[%c0_221, %c12_222, %c0_223, %c0_224] : memref<1x16x16x128xf32, #tpu.memory_space<vmem>>, vector<1x1x16x128xf32>
    %279 = vector.shape_cast %278 : vector<1x1x16x128xf32> to vector<16x128xf32>
    %280 = arith.maximumf %277, %279 : vector<16x128xf32>
    %c0_225 = arith.constant 0 : index
    %c13_226 = arith.constant 13 : index
    %c0_227 = arith.constant 0 : index
    %c0_228 = arith.constant 0 : index
    %281 = vector.load %arg2[%c0_225, %c13_226, %c0_227, %c0_228] : memref<1x16x16x128xf32, #tpu.memory_space<vmem>>, vector<1x1x16x128xf32>
    %282 = vector.shape_cast %281 : vector<1x1x16x128xf32> to vector<16x128xf32>
    %283 = arith.maximumf %280, %282 : vector<16x128xf32>
    %c0_229 = arith.constant 0 : index
    %c14_230 = arith.constant 14 : index
    %c0_231 = arith.constant 0 : index
    %c0_232 = arith.constant 0 : index
    %284 = vector.load %arg2[%c0_229, %c14_230, %c0_231, %c0_232] : memref<1x16x16x128xf32, #tpu.memory_space<vmem>>, vector<1x1x16x128xf32>
    %285 = vector.shape_cast %284 : vector<1x1x16x128xf32> to vector<16x128xf32>
    %286 = arith.maximumf %283, %285 : vector<16x128xf32>
    %c0_233 = arith.constant 0 : index
    %c15_234 = arith.constant 15 : index
    %c0_235 = arith.constant 0 : index
    %c0_236 = arith.constant 0 : index
    %287 = vector.load %arg2[%c0_233, %c15_234, %c0_235, %c0_236] : memref<1x16x16x128xf32, #tpu.memory_space<vmem>>, vector<1x1x16x128xf32>
    %288 = vector.shape_cast %287 : vector<1x1x16x128xf32> to vector<16x128xf32>
    %289 = arith.maximumf %286, %288 : vector<16x128xf32>
    %c15_i32_237 = arith.constant 15 : i32
    %290 = tpu.dynamic_rotate %289 by %c15_i32_237 dim 0 : vector<16x128xf32>, i32 -> vector<16x128xf32>
    %291 = arith.maximumf %289, %290 : vector<16x128xf32>
    %c14_i32_238 = arith.constant 14 : i32
    %292 = tpu.dynamic_rotate %289 by %c14_i32_238 dim 0 : vector<16x128xf32>, i32 -> vector<16x128xf32>
    %293 = arith.maximumf %291, %292 : vector<16x128xf32>
    %c13_i32_239 = arith.constant 13 : i32
    %294 = tpu.dynamic_rotate %289 by %c13_i32_239 dim 0 : vector<16x128xf32>, i32 -> vector<16x128xf32>
    %295 = arith.maximumf %293, %294 : vector<16x128xf32>
    %c12_i32_240 = arith.constant 12 : i32
    %296 = tpu.dynamic_rotate %289 by %c12_i32_240 dim 0 : vector<16x128xf32>, i32 -> vector<16x128xf32>
    %297 = arith.maximumf %295, %296 : vector<16x128xf32>
    %c11_i32_241 = arith.constant 11 : i32
    %298 = tpu.dynamic_rotate %289 by %c11_i32_241 dim 0 : vector<16x128xf32>, i32 -> vector<16x128xf32>
    %299 = arith.maximumf %297, %298 : vector<16x128xf32>
    %300 = vector.extract_strided_slice %299 {offsets = [0, 0], sizes = [1, 128], strides = [1, 1]} : vector<16x128xf32> to vector<1x128xf32>
    %301 = vector.extract_strided_slice %299 {offsets = [5, 0], sizes = [1, 128], strides = [1, 1]} : vector<16x128xf32> to vector<1x128xf32>
    %302 = vector.extract_strided_slice %299 {offsets = [10, 0], sizes = [1, 128], strides = [1, 1]} : vector<16x128xf32> to vector<1x128xf32>
    %303 = tpu.concatenate %300, %301, %302 in 0 : vector<1x128xf32>, vector<1x128xf32>, vector<1x128xf32> -> vector<3x128xf32>
    %304 = tpu.concatenate %241, %272, %303 in 0 : vector<3x128xf32>, vector<3x128xf32>, vector<3x128xf32> -> vector<9x128xf32>
    %c0_242 = arith.constant 0 : index
    %c5_243 = arith.constant 5 : index
    %c0_244 = arith.constant 0 : index
    %305 = vector.load %arg3[%c0_242, %c5_243, %c0_244] : memref<1x55x128xf32, #tpu.memory_space<vmem>>, vector<1x9x128xf32>
    %306 = vector.shape_cast %305 : vector<1x9x128xf32> to vector<9x128xf32>
    %307 = vector.shape_cast %304 : vector<9x128xf32> to vector<1x9x128xf32>
    tpu.vector_store %arg3[%c0_242, %c5_243, %c0_244], %307 {strides = array<i32>} : memref<1x55x128xf32, #tpu.memory_space<vmem>>, vector<1x9x128xf32>,
    %308 = vector.extract_strided_slice %207 {offsets = [0, 0], sizes = [1, 128], strides = [1, 1]} : vector<16x128xf32> to vector<1x128xf32>
    %309 = vector.extract_strided_slice %207 {offsets = [1, 0], sizes = [1, 128], strides = [1, 1]} : vector<16x128xf32> to vector<1x128xf32>
    %310 = arith.maximumf %308, %309 : vector<1x128xf32>
    %311 = vector.extract_strided_slice %207 {offsets = [4, 0], sizes = [1, 128], strides = [1, 1]} : vector<16x128xf32> to vector<1x128xf32>
    %312 = arith.maximumf %310, %311 : vector<1x128xf32>
    %313 = vector.extract_strided_slice %207 {offsets = [5, 0], sizes = [1, 128], strides = [1, 1]} : vector<16x128xf32> to vector<1x128xf32>
    %314 = arith.maximumf %312, %313 : vector<1x128xf32>
    %315 = vector.extract_strided_slice %207 {offsets = [2, 0], sizes = [1, 128], strides = [1, 1]} : vector<16x128xf32> to vector<1x128xf32>
    %316 = vector.extract_strided_slice %207 {offsets = [3, 0], sizes = [1, 128], strides = [1, 1]} : vector<16x128xf32> to vector<1x128xf32>
    %317 = arith.maximumf %315, %316 : vector<1x128xf32>
    %318 = vector.extract_strided_slice %207 {offsets = [6, 0], sizes = [1, 128], strides = [1, 1]} : vector<16x128xf32> to vector<1x128xf32>
    %319 = arith.maximumf %317, %318 : vector<1x128xf32>
    %320 = vector.extract_strided_slice %207 {offsets = [7, 0], sizes = [1, 128], strides = [1, 1]} : vector<16x128xf32> to vector<1x128xf32>
    %321 = arith.maximumf %319, %320 : vector<1x128xf32>
    %322 = tpu.concatenate %314, %321 in 0 : vector<1x128xf32>, vector<1x128xf32> -> vector<2x128xf32>
    %323 = vector.extract_strided_slice %207 {offsets = [8, 0], sizes = [1, 128], strides = [1, 1]} : vector<16x128xf32> to vector<1x128xf32>
    %324 = vector.extract_strided_slice %207 {offsets = [9, 0], sizes = [1, 128], strides = [1, 1]} : vector<16x128xf32> to vector<1x128xf32>
    %325 = arith.maximumf %323, %324 : vector<1x128xf32>
    %326 = vector.extract_strided_slice %207 {offsets = [12, 0], sizes = [1, 128], strides = [1, 1]} : vector<16x128xf32> to vector<1x128xf32>
    %327 = arith.maximumf %325, %326 : vector<1x128xf32>
    %328 = vector.extract_strided_slice %207 {offsets = [13, 0], sizes = [1, 128], strides = [1, 1]} : vector<16x128xf32> to vector<1x128xf32>
    %329 = arith.maximumf %327, %328 : vector<1x128xf32>
    %330 = vector.extract_strided_slice %207 {offsets = [10, 0], sizes = [1, 128], strides = [1, 1]} : vector<16x128xf32> to vector<1x128xf32>
    %331 = vector.extract_strided_slice %207 {offsets = [11, 0], sizes = [1, 128], strides = [1, 1]} : vector<16x128xf32> to vector<1x128xf32>
    %332 = arith.maximumf %330, %331 : vector<1x128xf32>
    %333 = vector.extract_strided_slice %207 {offsets = [14, 0], sizes = [1, 128], strides = [1, 1]} : vector<16x128xf32> to vector<1x128xf32>
    %334 = arith.maximumf %332, %333 : vector<1x128xf32>
    %335 = vector.extract_strided_slice %207 {offsets = [15, 0], sizes = [1, 128], strides = [1, 1]} : vector<16x128xf32> to vector<1x128xf32>
    %336 = arith.maximumf %334, %335 : vector<1x128xf32>
    %337 = tpu.concatenate %329, %336 in 0 : vector<1x128xf32>, vector<1x128xf32> -> vector<2x128xf32>
    %338 = tpu.concatenate %322, %337 in 0 : vector<2x128xf32>, vector<2x128xf32> -> vector<4x128xf32>
    %c0_245 = arith.constant 0 : index
    %c1_246 = arith.constant 1 : index
    %c0_247 = arith.constant 0 : index
    %339 = vector.load %arg3[%c0_245, %c1_246, %c0_247] : memref<1x55x128xf32, #tpu.memory_space<vmem>>, vector<1x4x128xf32>
    %340 = vector.shape_cast %339 : vector<1x4x128xf32> to vector<4x128xf32>
    %341 = vector.shape_cast %338 : vector<4x128xf32> to vector<1x4x128xf32>
    tpu.vector_store %arg3[%c0_245, %c1_246, %c0_247], %341 {strides = array<i32>} : memref<1x55x128xf32, #tpu.memory_space<vmem>>, vector<1x4x128xf32>,
    %342 = vector.extract_strided_slice %338 {offsets = [0, 0], sizes = [1, 128], strides = [1, 1]} : vector<4x128xf32> to vector<1x128xf32>
    %343 = vector.extract_strided_slice %338 {offsets = [1, 0], sizes = [1, 128], strides = [1, 1]} : vector<4x128xf32> to vector<1x128xf32>
    %344 = arith.maximumf %342, %343 : vector<1x128xf32>
    %345 = vector.extract_strided_slice %338 {offsets = [2, 0], sizes = [1, 128], strides = [1, 1]} : vector<4x128xf32> to vector<1x128xf32>
    %346 = arith.maximumf %344, %345 : vector<1x128xf32>
    %347 = vector.extract_strided_slice %338 {offsets = [3, 0], sizes = [1, 128], strides = [1, 1]} : vector<4x128xf32> to vector<1x128xf32>
    %348 = arith.maximumf %346, %347 : vector<1x128xf32>
    %c0_248 = arith.constant 0 : index
    %c0_249 = arith.constant 0 : index
    %c0_250 = arith.constant 0 : index
    %349 = vector.load %arg3[%c0_248, %c0_249, %c0_250] : memref<1x55x128xf32, #tpu.memory_space<vmem>>, vector<1x1x128xf32>
    %350 = vector.shape_cast %349 : vector<1x1x128xf32> to vector<1x128xf32>
    %351 = vector.shape_cast %348 : vector<1x128xf32> to vector<1x1x128xf32>
    tpu.vector_store %arg3[%c0_248, %c0_249, %c0_250], %351 {strides = array<i32>} : memref<1x55x128xf32, #tpu.memory_space<vmem>>, vector<1x1x128xf32>,
    return
  }
  func.func @transform_0(%arg0: i32, %arg1: i32) -> (i32, i32, i32, i32) {
    %c0_i32 = arith.constant 0 : i32
    %c0_i32_0 = arith.constant 0 : i32
    %c0_i32_1 = arith.constant 0 : i32
    return %arg0, %c0_i32, %c0_i32_0, %arg1 : i32, i32, i32, i32
  }
  func.func @transform_1(%arg0: i32, %arg1: i32) -> (i32, i32, i32) {
    %c0_i32 = arith.constant 0 : i32
    %c0_i32_0 = arith.constant 0 : i32
    return %arg0, %c0_i32, %arg1 : i32, i32, i32
  }
}

</mosaic_0001>

<bundles_post_ra>
// kernel: tpu_custom_call.1
= control target key start
LH: loop header
LB: loop body
LE: loop exit
PB: predicated region body
PF: predicated region fallthrough
CT: control target
= control target key end

     0   :  { %6 = vsyncpa [#allocation3], 0  ;;  %s1725_s0 = inlined_call_operand.hbm [shape: f32[2,16,16,128], index: 0, kind: input, shape index: {}]   ;;  %s1726_s1 = inlined_call_operand.vmem [shape: f32[2,55,128], index: 1, kind: output, shape index: {}]  }
   0x1   :  { %8 = vsyncpa [#allocation3 + $0x1], 0  ;;  %s1171_s6 = smov 0   ;;  %s1173_s7 = smov 0  }
   0x2   :  { %s1175_s8 = smov 0   ;;  %s1177_s9 = smov 0  }
   0x3   :  { %s1179_s10 = smov 0   ;;  %s1181_s11 = smov 0  }
   0x4 LB: > { %s915_s12 = sadd.s32 4294967295, %s1156_s11   ;;  %s26_s13 = sadd.s32 1, %s1152_s10  ;;  %s1156_s11 = sphi %s1181_s11, %s14_s11   ;;  %s1152_s10 = sphi %s1179_s10, %s1734_s10   ;;  %s1148_s9 = sphi %s1177_s9, %s1733_s9   ;;  %s1144_s8 = sphi %s1175_s8, %s1732_s8   ;;  %s1140_s7 = sphi %s1173_s7, %s1731_s7   ;;  %s1136_s6 = sphi %s1171_s6, %s1730_s6  }
   0x5   : > { %p28_p0 = scmp.ge.s32.totalorder %s26_s13, 2  ;;  %s35_s14 = sadd.s32 1, %s1144_s8 }
   0x6   : > { %p42_p1 = scmp.ne.s32.totalorder %s1144_s8, %s1140_s7  ;;  %p43_p2 = scmp.eq.s32.totalorder %s1156_s11, 0 }
   0x7   : > { %s1736_s13 = smov (%p28_p0, %s26_s13), 0  ;;  %p48_p4 = scmp.ne.s32.totalorder %s1140_s7, %s1136_s6 }
   0x8   : > { %p1207_p3 = por %p43_p2, %p42_p1  ;;  %s30_s16 = ssub.s32 %s1152_s10, %s1736_s13 }
   0x9   : > { %p49_p5 = scmp.eq.s32.totalorder %s915_s12, 0  ;;  %p33_p6 = scmp.eq.s32.totalorder %s30_s16, 0 }
   0xa   : > { %p1025_p8 = scmp.lt.s32.totalorder %s1156_s11, 2  ;;  %s100_s19 = sand.u32 1, %s1144_s8  }
   0xb   : > { %p1214_p7 = por %p49_p5, %p48_p4  ;;  %s1017_s20 = sshll.u32 %s1152_s10, 12 }
   0xc   : > { %s1220_s18 = scalar_select %p33_p6, %s1144_s8, %s35_s14  }
   0xd   : > { %s919_s21 = sshll.u32 %s100_s19, 8  ;;  %s1227_s24 = scalar_lea.hbm %s1725_s0, %s1017_s20 }
   0xe   : > { %s104_s25 = scalar_lea.vmem [#allocation2], %s919_s21  ;;  %p1231_p9 = pnand %p1025_p8, %p1207_p3 }
   0xf   : > { %s112_s26 = sshll.u32 %s104_s25, 4  ;;  %s1237_s28 = scalar_lea.sflag [#allocation3], %s100_s19  ;;  %s1235_s26 = int_to_ptr.vmem [resolvable:$true] %s112_s26 }
  0x10   : > { %s1076_s29 = scalar_lea.hbm %s1227_s24, 4096  ;;  %p1078_p11 = pneg %p1231_p9 }
  0x11   : > { %p1077_p10 = scmp.ne.s32.totalorder %s1227_s24, %s1076_s29  ;;  %s1081_s3 = scalar_lea.hbm %s1725_s0, 8192 }
  0x12   : > { %p1082_p0 = scmp.lt.u32.totalorder %s1227_s24, %s1725_s0  ;;  %p1083_p1 = scmp.lt.u32.totalorder %s1081_s3, %s1076_s29 }
  0x13   : > { %p1079_p12 = pnand %p1078_p11, %p1077_p10  ;;  %p1085_p3 = scmp.lt.u32.totalorder %s1076_s29, %s1227_s24 }
  0x14   : > { %p1084_p2 = por %p1083_p1, %p1082_p0 }
  0x15   : > { %p1080_p13 = pneg %p1079_p12 }
  0x16   : > { %p1086_p4 = por %p1085_p3, %p1084_p2 }
  0x18   : > { %p1087_p5 = pnand %p1086_p4, %p1080_p13 }
  0x1a   : > { %1090 = shalt.err (!%p1087_p5)
}
  0x1b   : > { %s1091_s6 = scalar_lea.vmem %s1235_s26, 4096  ;;  %s1158_s12 = smov [#allocation2]  }
  0x1c   : > { %p1092_p6 = scmp.ne.s32.totalorder %s1235_s26, %s1091_s6  ;;  %s1096_s14 = sshll.u32 %s1158_s12, 4  ;;  %s1097_s14 = int_to_ptr.vmem [resolvable:$false] %s1096_s14 }
  0x1d   : > { %s1098_s15 = scalar_lea.vmem %s1097_s14, 8192  ;;  %p1099_p12 = scmp.lt.s32.totalorder %s1235_s26, %s1097_s14 }
  0x1e   : > { %p1094_p8 = pnand %p1092_p6, %p1078_p11  ;;  %p1100_p0 = scmp.lt.s32.totalorder %s1098_s15, %s1091_s6 }
  0x20   : > { %p1095_p10 = pneg %p1094_p8  ;;  %p1101_p1 = por %p1100_p0, %p1099_p12 }
  0x22   : > { %p1102_p2 = pnand %p1101_p1, %p1095_p10 }
  0x24   : > { %1105 = shalt.err (!%p1102_p2)
}
  0x25   : > { %s1159_s16 = smov 128   ;;  %s1160_s19 = smov 8  }
  0x26   : > { %1024 = dma.hbm_to_vmem [thread:$0]  (!%p1231_p9), %s1227_s24, 4096, %s1235_s26, %s1237_s28, %s1159_s16, %s1159_s16, %s1160_s19  }
  0x27   : > { %p922_p11 = scmp.ge.s32.totalorder %s1156_s11, 1  ;;  %p120_p13 = scmp.lt.s32.totalorder %s1156_s11, 3 }
  0x29   : > { %p121_p3 = pnand %p922_p11, %p120_p13 }
  0x2a   : > { %s126_s20 = sand.u32 (!%p121_p3), 1, %s1140_s7  }
  0x2b   : > { %124 = sbr.rel (%p121_p3) target bundleno = 162 (0xa2), region = 24  ;;  %s923_s21 = sshll.u32 (!%p121_p3), %s126_s20, 8 }
  0x2c   : > { %s127_s22 = scalar_lea.sflag (!%p121_p3), [#allocation3], %s126_s20  ;;  %s1268_s23 = scalar_lea.vmem (!%p121_p3), [#allocation2], %s923_s21 }
  0x32   : > { %1131 = dma.done.wait (%p1214_p7), %s127_s22, 4096  }
  0x33   : > { %1133 = vsyncadd (%p1214_p7), %s127_s22, 4294963200  ;;  %v179_v0 = vlaneseq  ;;  %v160_v2 = vld [vmem:[%s1268_s23] sm:$0xff]  ;;  %v161_v3 = vld [vmem:[%s1268_s23 + $0x8] sm:$0xff]  ;;  %vm208_vm3 = vcmask 1040384   ;;  %vm210_vm4 = vcmask 1041408   ;;  %vm212_vm5 = vcmask 1042432  }
  0x34   : > { %v925_v4 = vld [vmem:[%s1268_s23 + $0x10] sm:$0xff]  ;;  %v926_v5 = vld [vmem:[%s1268_s23 + $0x18] sm:$0xff]  ;;  %v927_v7 = vld [vmem:[%s1268_s23 + $0x20] sm:$0xff]  ;;  %vm214_vm6 = vcmask 1043456   ;;  %p152_p7 = scmp.lt.s32.totalorder %s1148_s9, 1  ;;  %vm408_vm7 = vcmask 1044480  }
  0x35   : > { %v1274_v1 = vshrl.u32 %v179_v0, 7  ;;  %v165_v6 = vmax.f32 %v160_v2, %v925_v4  ;;  %v928_v8 = vld [vmem:[%s1268_s23 + $0x28] sm:$0xff]  ;;  %v166_v9 = vmax.f32 %v161_v3, %v926_v5  ;;  %v929_v10 = vld [vmem:[%s1268_s23 + $0x30] sm:$0xff]  ;;  %v930_v11 = vld [vmem:[%s1268_s23 + $0x38] sm:$0xff]  ;;  %vm411_vm8 = vcmask 1046528  }
  0x36   : > { %v1286_v12 = vld [vmem:[%s1268_s23 + $0x40] sm:$0xff]  ;;  %v1291_v14 = vld [vmem:[%s1268_s23 + $0x48] sm:$0xff]  ;;  %v1295_v16 = vld [vmem:[%s1268_s23 + $0x50] sm:$0xff]  ;;  %s1738_s9 = smov (!%p152_p7, %s1148_s9), 1  ;;  %vm776_vm11 = vcmask 1045504  }
  0x37   : > { %vm181_vm0 = vcmp.lt.s32.totalorder %v1274_v1, 7  ;;  %v170_v13 = vmax.f32 %v165_v6, %v927_v7  ;;  %vm188_vm1 = vcmp.lt.s32.totalorder %v1274_v1, 6  ;;  %vm195_vm2 = vcmp.lt.s32.totalorder %v1274_v1, 5  ;;  %v1298_v17 = vld [vmem:[%s1268_s23 + $0x58] sm:$0xff]  ;;  %v1302_v20 = vld [vmem:[%s1268_s23 + $0x60] sm:$0xff]  ;;  %v1305_v21 = vld [vmem:[%s1268_s23 + $0x70] sm:$0xff] }
  0x38   : > { %v219_v15 = vmax.f32 %v929_v10, %v1286_v12  ;;  %v171_v18 = vmax.f32 %v166_v9, %v928_v8  ;;  %v220_v19 = vmax.f32 %v930_v11, %v1291_v14  ;;  %v465_v22 = vmax.f32 %v1286_v12, %v1295_v16  ;;  %v1315_v26 = vld [vmem:[%s1268_s23 + $0x68] sm:$0xff]  ;;  %v1318_v27 = vld [vmem:[%s1268_s23 + $0x78] sm:$0xff]  ;;  %v1341_v42 = vld [vmem:[%s1268_s23 + $0x80] sm:$0xff]  ;;  %s1018_s17 = smul.u32 56, %s1738_s9 }
  0x39   : > { %v466_v23 = vmax.f32 %v1291_v14, %v1298_v17  ;;  %v1311_v24 = vmax.f32 %v170_v13, %v929_v10  ;;  %v264_v28 = vmax.f32 %v1302_v20, %v1305_v21  ;;  %v661_v29 = vmax.f32 %v1295_v16, %v1302_v20  ;;  %v1359_v55 = vld [vmem:[%s1268_s23 + $0x88] sm:$0xff]  ;;  %v1363_v60 = vld [vmem:[%s1268_s23 + $0x90] sm:$0xff]  ;;  %v1366_v61 = vld [vmem:[%s1268_s23 + $0xa0] sm:$0xff] }
  0x3a   : > { %v224_v25 = vmax.f32 %v219_v15, %v1295_v16  ;;  %v1324_v30 = vmax.f32 %v171_v18, %v930_v11  ;;  %v225_v31 = vmax.f32 %v220_v19, %v1298_v17  ;;  %v265_v32 = vmax.f32 %v1315_v26, %v1318_v27  ;;  %v1385_v11 = vld [vmem:[%s1268_s23 + $0x98] sm:$0xff]  ;;  %s1463_s25 = scalar_lea.vmem %s1726_s1, %s1018_s17 }
  0x3b   : > { %v1330_v33 = vmax.f32 %v465_v22, %v1302_v20  ;;  %v177_v34 = vrot.slane %v1311_v24, 1  ;;  %v186_v35 = vrot.slane %v1311_v24, 2  ;;  %v193_v36 = vrot.slane %v1311_v24, 3 }
  0x3c   : > { %v229_v37 = vmax.f32 %v224_v25, %v1302_v20  ;;  %v178_v38 = vrot.slane %v1324_v30, 1  ;;  %v187_v39 = vrot.slane %v1324_v30, 2  ;;  %v194_v40 = vrot.slane %v1324_v30, 3 }
  0x3d   : > { %v230_v41 = vmax.f32 %v225_v31, %v1315_v26  ;;  %v269_v46 = vmax.f32 %v264_v28, %v1341_v42  ;;  %v270_v59 = vmax.f32 %v265_v32, %v1359_v55  ;;  %v309_v2 = vmax.f32 %v1363_v60, %v1366_v61 }
  0x3e   : > { %v231_v43 = vrot.slane %v229_v37, 1  ;;  %v237_v44 = vrot.slane %v229_v37, 2  ;;  %v243_v45 = vrot.slane %v229_v37, 3  ;;  %v182_v47 = vsel %vm181_vm0, %v177_v34, %v178_v38 }
  0x3f   : > { %v183_v48 = vsel %vm181_vm0, %v178_v38, %v177_v34  ;;  %v189_v49 = vsel %vm188_vm1, %v186_v35, %v187_v39  ;;  %v190_v50 = vsel %vm188_vm1, %v187_v39, %v186_v35  ;;  %v184_v51 = vmax.f32 %v1311_v24, %v182_v47 }
  0x40   : > { %v185_v52 = vmax.f32 %v1324_v30, %v183_v48  ;;  %v196_v53 = vsel %vm195_vm2, %v193_v36, %v194_v40  ;;  %v197_v54 = vsel %vm195_vm2, %v194_v40, %v193_v36  ;;  %v232_v56 = vrot.slane %v230_v41, 1 }
  0x41   : > { %v238_v57 = vrot.slane %v230_v41, 2  ;;  %v244_v58 = vrot.slane %v230_v41, 3  ;;  %v191_v62 = vmax.f32 %v184_v51, %v189_v49  ;;  %v274_v0 = vmax.f32 %v269_v46, %v1363_v60 }
  0x42   : > { %v192_v63 = vmax.f32 %v185_v52, %v190_v50  ;;  %v233_v3 = vsel %vm181_vm0, %v231_v43, %v232_v56  ;;  %v234_v4 = vsel %vm181_vm0, %v232_v56, %v231_v43  ;;  %v275_v18 = vmax.f32 %v270_v59, %v1385_v11  ;;  %v1418_v56 = vld [vmem:[%s1268_s23 + $0xd0] sm:$0xff] }
  0x43   : > { %v239_v5 = vsel %vm188_vm1, %v237_v44, %v238_v57  ;;  %v240_v6 = vsel %vm188_vm1, %v238_v57, %v237_v44  ;;  %v1380_v7 = vmax.f32 %v191_v62, %v196_v53  ;;  %v235_v9 = vmax.f32 %v229_v37, %v233_v3  ;;  %v1433_v3 = vld [vmem:[%s1268_s23 + $0xd8] sm:$0xff] }
  0x44   : > { %v1382_v8 = vmax.f32 %v192_v63, %v197_v54  ;;  %v236_v10 = vmax.f32 %v230_v41, %v234_v4  ;;  %v245_v13 = vsel %vm195_vm2, %v243_v45, %v244_v58  ;;  %v246_v15 = vsel %vm195_vm2, %v244_v58, %v243_v45  ;;  %v1415_v54 = vld [vmem:[%s1268_s23 + $0xc0] sm:$0xff]  ;;  %v1427_v63 = vld [vmem:[%s1268_s23 + $0xa8] sm:$0xff] }
  0x45   : > { %v276_v19 = vrot.slane %v274_v0, 1  ;;  %v201_v22 = vrot.slane %v1380_v7, 2  ;;  %v203_v25 = vrot.slane %v1380_v7, 4  ;;  %v241_v31 = vmax.f32 %v235_v9, %v239_v5 }
  0x46   : > { %v206_v28 = vrot.slane %v1382_v8, 6  ;;  %v242_v32 = vmax.f32 %v236_v10, %v240_v6  ;;  %v277_v34 = vrot.slane %v275_v18, 1  ;;  %v282_v35 = vrot.slane %v274_v0, 2  ;;  %v1441_v10 = vld [vmem:[%s1268_s23 + $0xb0] sm:$0xff] }
  0x47   : > { %v283_v36 = vrot.slane %v275_v18, 2  ;;  %v209_v37 = vsel %vm208_vm3, %v1380_v7, %v201_v22  ;;  %v247_v38 = vmax.f32 %v241_v31, %v245_v13  ;;  %v288_v39 = vrot.slane %v274_v0, 3  ;;  %v1454_v31 = vld [vmem:[%s1268_s23 + $0xe8] sm:$0xff] }
  0x48   : > { %v289_v40 = vrot.slane %v275_v18, 3  ;;  %v211_v41 = vsel %vm210_vm4, %v209_v37, %v203_v25  ;;  %v248_v43 = vmax.f32 %v242_v32, %v246_v15  ;;  %v278_v44 = vsel %vm181_vm0, %v276_v19, %v277_v34  ;;  %v1451_v25 = vld [vmem:[%s1268_s23 + $0xe0] sm:$0xff] }
  0x49   : > { %v279_v45 = vsel %vm181_vm0, %v277_v34, %v276_v19  ;;  %v213_v46 = vsel %vm212_vm5, %v211_v41, %v206_v28  ;;  %v250_v47 = vrot.slane %v247_v38, 2  ;;  %v252_v48 = vrot.slane %v247_v38, 4 }
  0x4a   : > { %v280_v49 = vmax.f32 %v274_v0, %v278_v44  ;;  %v215_v50 = vsel %vm214_vm6, %v213_v46, %v1382_v8  ;;  %v255_v51 = vrot.slane %v248_v43, 6  ;;  %v281_v52 = vmax.f32 %v275_v18, %v279_v45  ;;  %v1430_v0 = vld [vmem:[%s1268_s23 + $0xc8] sm:$0xff]  ;;  %v1445_v18 = vld [vmem:[%s1268_s23 + $0xb8] sm:$0xff]  ;;  %v1470_v45 = vld [vmem:[%s1268_s23 + $0xf0] sm:$0xff] }
  0x4b   : > { %v284_v53 = vsel %vm188_vm1, %v282_v35, %v283_v36  ;;  %v257_v57 = vsel %vm208_vm3, %v247_v38, %v250_v47  ;;  %v285_v58 = vsel %vm188_vm1, %v283_v36, %v282_v35  ;;  %v290_v62 = vsel %vm195_vm2, %v288_v39, %v289_v40  ;;  %v1473_v46 = vld [vmem:[%s1268_s23 + $0xf8] sm:$0xff] }
  0x4c   : > { %v286_v59 = vmax.f32 %v280_v49, %v284_v53  ;;  %v258_v4 = vsel %vm210_vm4, %v257_v57, %v252_v48  ;;  %v287_v5 = vmax.f32 %v281_v52, %v285_v58  ;;  %v291_v6 = vsel %vm195_vm2, %v289_v40, %v288_v39 }
  0x4d   : > { %v310_v9 = vmax.f32 %v1385_v11, %v1427_v63  ;;  %v259_v13 = vsel %vm212_vm5, %v258_v4, %v255_v51  ;;  %v314_v19 = vmax.f32 %v309_v2, %v1441_v10  ;;  %v354_v22 = vmax.f32 %v1415_v54, %v1418_v56 }
  0x4e   : > { %v292_v15 = vmax.f32 %v286_v59, %v290_v62  ;;  %v260_v32 = vsel %vm214_vm6, %v259_v13, %v248_v43  ;;  %v293_v34 = vmax.f32 %v287_v5, %v291_v6  ;;  %v355_v36 = vmax.f32 %v1430_v0, %v1433_v3 }
  0x4f   : > { %v315_v35 = vmax.f32 %v310_v9, %v1445_v18  ;;  %v397_v2 = vrot.slane %v260_v32, 3  ;;  %v319_v39 = vmax.f32 %v314_v19, %v1415_v54  ;;  %v359_v43 = vmax.f32 %v354_v22, %v1451_v25 }
  0x50   : > { %v295_v37 = vrot.slane %v292_v15, 2  ;;  %v297_v38 = vrot.slane %v292_v15, 4  ;;  %v300_v40 = vrot.slane %v293_v34, 6  ;;  %v360_v44 = vmax.f32 %v355_v36, %v1454_v31 }
  0x51   : > { %v320_v41 = vmax.f32 %v315_v35, %v1430_v0  ;;  %v409_v47 = vsel %vm408_vm7, %v215_v50, %v397_v2  ;;  %v321_v49 = vrot.slane %v319_v39, 1  ;;  %v327_v51 = vrot.slane %v319_v39, 2 }
  0x52   : > { %v302_v48 = vsel %vm208_vm3, %v292_v15, %v295_v37  ;;  %414 = vst [vmem:[%s1463_s25 + $0x1e] sm:$0xff] %v409_v47  ;;  %v333_v58 = vrot.slane %v319_v39, 3  ;;  %v364_v4 = vmax.f32 %v359_v43, %v1470_v45  ;;  %v365_v5 = vmax.f32 %v360_v44, %v1473_v46 }
  0x53   : > { %v303_v52 = vsel %vm210_vm4, %v302_v48, %v297_v38  ;;  %v322_v53 = vrot.slane %v320_v41, 1  ;;  %v328_v57 = vrot.slane %v320_v41, 2  ;;  %v334_v62 = vrot.slane %v320_v41, 3 }
  0x54   : > { %v304_v59 = vsel %vm212_vm5, %v303_v52, %v300_v40  ;;  %v366_v36 = vrot.slane %v364_v4, 1  ;;  %v367_v37 = vrot.slane %v365_v5, 1  ;;  %v372_v43 = vrot.slane %v364_v4, 2 }
  0x55   : > { %v305_v6 = vsel %vm214_vm6, %v304_v59, %v293_v34  ;;  %v323_v50 = vsel %vm181_vm0, %v321_v49, %v322_v53  ;;  %v324_v9 = vsel %vm181_vm0, %v322_v53, %v321_v49  ;;  %v329_v13 = vsel %vm188_vm1, %v327_v51, %v328_v57 }
  0x56   : > { %v325_v15 = vmax.f32 %v319_v39, %v323_v50  ;;  %v326_v19 = vmax.f32 %v320_v41, %v324_v9  ;;  %v330_v22 = vsel %vm188_vm1, %v328_v57, %v327_v51  ;;  %v335_v32 = vsel %vm195_vm2, %v333_v58, %v334_v62 }
  0x57   : > { %v336_v34 = vsel %vm195_vm2, %v334_v62, %v333_v58  ;;  %v400_v35 = vrot.slane %v305_v6, 6  ;;  %v373_v44 = vrot.slane %v365_v5, 2  ;;  %v368_v39 = vsel %vm181_vm0, %v366_v36, %v367_v37 }
  0x58   : > { %v331_v38 = vmax.f32 %v325_v15, %v329_v13  ;;  %v332_v40 = vmax.f32 %v326_v19, %v330_v22  ;;  %v369_v41 = vsel %vm181_vm0, %v367_v37, %v366_v36  ;;  %v378_v48 = vrot.slane %v364_v4, 3 }
  0x59   : > { %v410_v47 = vsel %vm210_vm4, %v397_v2, %v400_v35  ;;  %v370_v52 = vmax.f32 %v364_v4, %v368_v39  ;;  %v371_v53 = vmax.f32 %v365_v5, %v369_v41  ;;  %v374_v57 = vsel %vm188_vm1, %v372_v43, %v373_v44 }
  0x5a   : > { %v337_v49 = vmax.f32 %v331_v38, %v335_v32  ;;  %v338_v51 = vmax.f32 %v332_v40, %v336_v34  ;;  %v375_v58 = vsel %vm188_vm1, %v373_v44, %v372_v43  ;;  %v379_v59 = vrot.slane %v365_v5, 3 }
  0x5b   : > { %v451_v2 = vrot.slane %v1380_v7, 3  ;;  %v376_v9 = vmax.f32 %v370_v52, %v374_v57  ;;  %v377_v13 = vmax.f32 %v371_v53, %v375_v58  ;;  %v456_v19 = vrot.slane %v1382_v8, 1 }
  0x5c   : > { %v340_v62 = vrot.slane %v337_v49, 2  ;;  %v342_v6 = vrot.slane %v337_v49, 4  ;;  %v345_v50 = vrot.slane %v338_v51, 6  ;;  %v380_v15 = vsel %vm195_vm2, %v378_v48, %v379_v59 }
  0x5d   : > { %v381_v4 = vsel %vm195_vm2, %v379_v59, %v378_v48  ;;  %v382_v32 = vmax.f32 %v376_v9, %v380_v15  ;;  %v458_v5 = vsel %vm208_vm3, %v1380_v7, %v451_v2  ;;  %v470_v34 = vmax.f32 %v466_v23, %v1315_v26 }
  0x5e   : > { %v347_v22 = vsel %vm208_vm3, %v337_v49, %v340_v62  ;;  %v1518_v36 = vmax.f32 %v377_v13, %v381_v4  ;;  %v459_v37 = vsel %vm210_vm4, %v458_v5, %v206_v28  ;;  %v473_v38 = vmax.f32 %v1330_v33, %v1305_v21 }
  0x5f   : > { %v348_v35 = vsel %vm210_vm4, %v347_v22, %v342_v6  ;;  %v385_v43 = vrot.slane %v382_v32, 2  ;;  %v387_v7 = vrot.slane %v382_v32, 4  ;;  %v1527_v44 = vsel %vm212_vm5, %v459_v37, %v456_v19 }
  0x60   : > { %v349_v40 = vsel %vm212_vm5, %v348_v35, %v345_v50  ;;  %v390_v39 = vrot.slane %v1518_v36, 6  ;;  %v474_v41 = vmax.f32 %v470_v34, %v1318_v27  ;;  %v475_v8 = vrot.slane %v473_v38, 1 }
  0x61   : > { %v350_v23 = vsel %vm214_vm6, %v349_v40, %v338_v51  ;;  %v392_v28 = vsel %vm208_vm3, %v382_v32, %v385_v43  ;;  %v481_v49 = vrot.slane %v473_v38, 2  ;;  %v487_v33 = vrot.slane %v473_v38, 3 }
  0x62   : > { %v403_v48 = vrot.slane %v350_v23, 1  ;;  %v393_v52 = vsel %vm210_vm4, %v392_v28, %v387_v7  ;;  %v476_v53 = vrot.slane %v474_v41, 1  ;;  %v482_v57 = vrot.slane %v474_v41, 2 }
  0x63   : > { %v488_v58 = vrot.slane %v474_v41, 3  ;;  %v394_v51 = vsel %vm212_vm5, %v393_v52, %v390_v39  ;;  %v508_v2 = vmax.f32 %v1341_v42, %v1363_v60  ;;  %v509_v62 = vmax.f32 %v1359_v55, %v1385_v11 }
  0x64   : > { %v412_v59 = vsel %vm411_vm8, %v410_v47, %v403_v48  ;;  %v395_v6 = vsel %vm214_vm6, %v394_v51, %v1518_v36  ;;  %v477_v50 = vsel %vm181_vm0, %v475_v8, %v476_v53  ;;  %v478_v47 = vsel %vm181_vm0, %v476_v53, %v475_v8 }
  0x65   : > { %415 = vst [vmem:[%s1463_s25 + $0x26] sm:$0xff] %v412_v59  ;;  %v483_v9 = vsel %vm188_vm1, %v481_v49, %v482_v57  ;;  %v406_v13 = vrot.slane %v395_v6, 4  ;;  %v479_v15 = vmax.f32 %v473_v38, %v477_v50  ;;  %v480_v4 = vmax.f32 %v474_v41, %v478_v47 }
  0x66   : > { %v484_v19 = vsel %vm188_vm1, %v482_v57, %v481_v49  ;;  %v489_v22 = vsel %vm195_vm2, %v487_v33, %v488_v58  ;;  %v490_v5 = vsel %vm195_vm2, %v488_v58, %v487_v33  ;;  %v512_v34 = vmax.f32 %v508_v2, %v1366_v61 }
  0x67   : > { %v513_v35 = vmax.f32 %v509_v62, %v1427_v63  ;;  %v413_v37 = vsel %vm214_vm6, %v403_v48, %v406_v13  ;;  %417 = vst [vmem:[%s1463_s25 + $0x36] sm:$0x1] %v406_v13  ;;  %v485_v40 = vmax.f32 %v479_v15, %v483_v9  ;;  %v486_v43 = vmax.f32 %v480_v4, %v484_v19 }
  0x68   : > { %v580_v38 = vrot.slane %v382_v32, 3  ;;  %416 = vst [vmem:[%s1463_s25 + $0x2e] sm:$0xff] %v413_v37  ;;  %v516_v7 = vmax.f32 %v512_v34, %v1441_v10  ;;  %v585_v41 = vrot.slane %v1518_v36, 1  ;;  %v616_v8 = vmax.f32 %v1311_v24, %v1286_v12 }
  0x69   : > { %v517_v23 = vmax.f32 %v513_v35, %v1445_v18  ;;  %v491_v28 = vmax.f32 %v485_v40, %v489_v22  ;;  %v492_v49 = vmax.f32 %v486_v43, %v490_v5  ;;  %v617_v48 = vmax.f32 %v1324_v30, %v1291_v14 }
  0x6a   : > { %v587_v33 = vsel %vm208_vm3, %v382_v32, %v580_v38  ;;  %v518_v52 = vrot.slane %v516_v7, 1  ;;  %v524_v57 = vrot.slane %v516_v7, 2  ;;  %v530_v62 = vrot.slane %v516_v7, 3 }
  0x6b   : > { %v519_v53 = vrot.slane %v517_v23, 1  ;;  %v525_v58 = vrot.slane %v517_v23, 2  ;;  %v494_v59 = vrot.slane %v491_v28, 3  ;;  %v497_v51 = vrot.slane %v492_v49, 6 }
  0x6c   : > { %v499_v2 = vrot.slane %v492_v49, 1  ;;  %v531_v50 = vrot.slane %v517_v23, 3  ;;  %v588_v9 = vsel %vm210_vm4, %v587_v33, %v390_v39  ;;  %v1580_v13 = vmax.f32 %v616_v8, %v1295_v16 }
  0x6d   : > { %v520_v36 = vsel %vm181_vm0, %v518_v52, %v519_v53  ;;  %v521_v12 = vsel %vm181_vm0, %v519_v53, %v518_v52  ;;  %v526_v24 = vsel %vm188_vm1, %v524_v57, %v525_v58  ;;  %v527_v14 = vsel %vm188_vm1, %v525_v58, %v524_v57 }
  0x6e   : > { %v501_v30 = vsel %vm208_vm3, %v491_v28, %v494_v59  ;;  %v522_v32 = vmax.f32 %v516_v7, %v520_v36  ;;  %v523_v6 = vmax.f32 %v517_v23, %v521_v12  ;;  %v621_v15 = vmax.f32 %v617_v48, %v1298_v17 }
  0x6f   : > { %v502_v47 = vsel %vm210_vm4, %v501_v30, %v497_v51  ;;  %v532_v5 = vsel %vm195_vm2, %v530_v62, %v531_v50  ;;  %v533_v35 = vsel %vm195_vm2, %v531_v50, %v530_v62  ;;  %v589_v37 = vsel %vm212_vm5, %v588_v9, %v585_v41 }
  0x70   : > { %v503_v4 = vsel %vm212_vm5, %v502_v47, %v499_v2  ;;  %v528_v19 = vmax.f32 %v522_v32, %v526_v24  ;;  %v529_v22 = vmax.f32 %v523_v6, %v527_v14  ;;  %v622_v39 = vrot.slane %v1580_v13, 1 }
  0x71   : > { %v591_v34 = vrot.slane %v503_v4, 4  ;;  %v594_v38 = vrot.slane %v589_v37, 4  ;;  %v623_v7 = vrot.slane %v621_v15, 1  ;;  %v628_v8 = vrot.slane %v1580_v13, 2 }
  0x72   : > { %v534_v40 = vmax.f32 %v528_v19, %v532_v5  ;;  %v535_v43 = vmax.f32 %v529_v22, %v533_v35  ;;  %v629_v28 = vrot.slane %v621_v15, 2  ;;  %v634_v49 = vrot.slane %v1580_v13, 3 }
  0x73   : > { %v596_v23 = vsel %vm214_vm6, %v1527_v44, %v591_v34  ;;  %vm642_vm9 = vcmp.lt.s32.totalorder %v1274_v1, 4  ;;  %vm649_vm10 = vcmp.lt.s32.totalorder %v1274_v1, 3  ;;  %v624_v58 = vsel %vm181_vm0, %v622_v39, %v623_v7 }
  0x74   : > { %598 = vst [vmem:[%s1463_s25 + $0xe] sm:$0xff] %v596_v23  ;;  %v781_v33 = vrot.slane %v596_v23, 1  ;;  %v784_v48 = vrot.slane %v596_v23, 4  ;;  %v787_v52 = vrot.slane %v596_v23, 5  ;;  %v537_v53 = vrot.slane %v534_v40, 3 }
  0x75   : > { %v540_v41 = vrot.slane %v535_v43, 6  ;;  %v542_v57 = vrot.slane %v535_v43, 1  ;;  %v625_v44 = vsel %vm181_vm0, %v623_v7, %v622_v39  ;;  %v626_v2 = vmax.f32 %v1580_v13, %v624_v58 }
  0x76   : > { %v783_v59 = vmax.f32 %v596_v23, %v781_v33  ;;  %v544_v51 = vsel %vm208_vm3, %v534_v40, %v537_v53  ;;  %v627_v62 = vmax.f32 %v621_v15, %v625_v44  ;;  %v630_v12 = vsel %vm188_vm1, %v628_v8, %v629_v28 }
  0x77   : > { %v545_v36 = vsel %vm210_vm4, %v544_v51, %v540_v41  ;;  %v631_v24 = vsel %vm188_vm1, %v629_v28, %v628_v8  ;;  %v635_v14 = vrot.slane %v621_v15, 3  ;;  %v632_v6 = vmax.f32 %v626_v2, %v630_v12 }
  0x78   : > { %v786_v30 = vmax.f32 %v783_v59, %v784_v48  ;;  %v546_v32 = vsel %vm212_vm5, %v545_v36, %v542_v57  ;;  %v633_v50 = vmax.f32 %v627_v62, %v631_v24  ;;  %v640_v19 = vrot.slane %v1580_v13, 4 }
  0x79   : > { %v597_v47 = vsel %vm214_vm6, %v546_v32, %v594_v38  ;;  %v636_v9 = vsel %vm195_vm2, %v634_v49, %v635_v14  ;;  %v637_v4 = vsel %vm195_vm2, %v635_v14, %v634_v49  ;;  %v641_v39 = vrot.slane %v621_v15, 4 }
  0x7a   : > { %599 = vst [vmem:[%s1463_s25 + $0x16] sm:$0xff] %v597_v47  ;;  %v795_v22 = vrot.slane %v597_v47, 1  ;;  %v798_v5 = vrot.slane %v597_v47, 4  ;;  %v801_v34 = vrot.slane %v597_v47, 5  ;;  %v638_v35 = vmax.f32 %v632_v6, %v636_v9 }
  0x7b   : > { %v639_v37 = vmax.f32 %v633_v50, %v637_v4  ;;  %v647_v40 = vrot.slane %v1580_v13, 5  ;;  %v648_v43 = vrot.slane %v621_v15, 5  ;;  %v662_v38 = vmax.f32 %v1298_v17, %v1315_v26 }
  0x7c   : > { %v797_v7 = vmax.f32 %v597_v47, %v795_v22  ;;  %v665_v23 = vmax.f32 %v661_v29, %v1305_v21  ;;  %v716_v8 = vmax.f32 %v1366_v61, %v1441_v10  ;;  %v643_v28 = vsel %vm642_vm9, %v640_v19, %v641_v39 }
  0x7d   : > { %v644_v49 = vsel %vm642_vm9, %v641_v39, %v640_v19  ;;  %v650_v13 = vsel %vm649_vm10, %v647_v40, %v648_v43  ;;  %v651_v17 = vsel %vm649_vm10, %v648_v43, %v647_v40  ;;  %v645_v15 = vmax.f32 %v638_v35, %v643_v28 }
  0x7e   : > { %v800_v26 = vmax.f32 %v797_v7, %v798_v5  ;;  %v646_v33 = vmax.f32 %v639_v37, %v644_v49  ;;  %v666_v16 = vmax.f32 %v662_v38, %v1318_v27  ;;  %v669_v20 = vmax.f32 %v665_v23, %v1341_v42 }
  0x7f   : > { %v717_v21 = vmax.f32 %v1427_v63, %v1445_v18  ;;  %v720_v29 = vmax.f32 %v716_v8, %v1415_v54  ;;  %v789_v10 = vmax.f32 %v786_v30, %v787_v52  ;;  %v652_v53 = vmax.f32 %v645_v15, %v650_v13 }
  0x80   : > { %v803_v48 = vmax.f32 %v800_v26, %v801_v34  ;;  %v653_v41 = vmax.f32 %v646_v33, %v651_v17  ;;  %v670_v57 = vmax.f32 %v666_v16, %v1359_v55  ;;  %v673_v58 = vmax.f32 %v669_v20, %v1363_v60 }
  0x81   : > { %v721_v44 = vmax.f32 %v717_v21, %v1430_v0  ;;  %v724_v59 = vmax.f32 %v720_v29, %v1418_v56  ;;  %v655_v27 = vrot.slane %v652_v53, 4  ;;  %v791_v52 = vrot.slane %v789_v10, 1 }
  0x82   : > { %v674_v42 = vmax.f32 %v670_v57, %v1385_v11  ;;  %v805_v51 = vrot.slane %v803_v48, 1  ;;  %v677_v18 = vmax.f32 %v673_v58, %v1366_v61 }
  0x83   : > { %v725_v54 = vmax.f32 %v721_v44, %v1433_v3  ;;  %v657_v2 = vsel %vm208_vm3, %v652_v53, %v655_v27  ;;  %v728_v55 = vmax.f32 %v724_v59, %v1451_v25  ;;  %v793_v7 = vsel %vm208_vm3, %v789_v10, %v791_v52 }
  0x84   : > { %v678_v62 = vmax.f32 %v674_v42, %v1427_v63  ;;  %v807_v60 = vsel %vm208_vm3, %v803_v48, %v805_v51  ;;  %v1650_v0 = vsel %vm210_vm4, %v657_v2, %v653_v41  ;;  %v679_v56 = vrot.slane %v677_v18, 1 }
  0x85   : > { %v685_v36 = vrot.slane %v677_v18, 2  ;;  %v691_v11 = vrot.slane %v677_v18, 3  ;;  %v697_v14 = vrot.slane %v677_v18, 4  ;;  %v703_v30 = vrot.slane %v677_v18, 5 }
  0x86   : > { %v680_v12 = vrot.slane %v678_v62, 1  ;;  %v686_v24 = vrot.slane %v678_v62, 2  ;;  %v692_v61 = vrot.slane %v678_v62, 3  ;;  %v698_v3 = vrot.slane %v678_v62, 4 }
  0x87   : > { %v704_v32 = vrot.slane %v678_v62, 5  ;;  %v729_v6 = vmax.f32 %v725_v54, %v1454_v31  ;;  %v732_v40 = vmax.f32 %v728_v55, %v1470_v45  ;;  %v809_v38 = vrot.slane %v807_v60, 6 }
  0x88   : > { %v681_v63 = vsel %vm181_vm0, %v679_v56, %v680_v12  ;;  %v682_v25 = vsel %vm181_vm0, %v680_v12, %v679_v56  ;;  %v687_v50 = vsel %vm188_vm1, %v685_v36, %v686_v24  ;;  %v688_v47 = vsel %vm188_vm1, %v686_v24, %v685_v36 }
  0x89   : > { %v683_v9 = vmax.f32 %v677_v18, %v681_v63  ;;  %v684_v4 = vmax.f32 %v678_v62, %v682_v25  ;;  %v693_v19 = vsel %vm195_vm2, %v691_v11, %v692_v61  ;;  %v694_v31 = vsel %vm195_vm2, %v692_v61, %v691_v11 }
  0x8a   : > { %v699_v22 = vsel %vm642_vm9, %v697_v14, %v698_v3  ;;  %v700_v5 = vsel %vm642_vm9, %v698_v3, %v697_v14  ;;  %v705_v34 = vsel %vm649_vm10, %v703_v30, %v704_v32  ;;  %v706_v35 = vsel %vm649_vm10, %v704_v32, %v703_v30 }
  0x8b   : > { %v689_v37 = vmax.f32 %v683_v9, %v687_v50  ;;  %v690_v39 = vmax.f32 %v684_v4, %v688_v47  ;;  %v733_v43 = vmax.f32 %v729_v6, %v1473_v46  ;;  %v734_v28 = vrot.slane %v732_v40, 1 }
  0x8c   : > { %v740_v13 = vrot.slane %v732_v40, 2  ;;  %v746_v26 = vrot.slane %v732_v40, 3  ;;  %v752_v59 = vrot.slane %v732_v40, 4  ;;  %v758_v51 = vrot.slane %v732_v40, 5 }
  0x8d   : > { %v695_v23 = vmax.f32 %v689_v37, %v693_v19  ;;  %v696_v8 = vmax.f32 %v690_v39, %v694_v31  ;;  %v735_v49 = vrot.slane %v733_v43, 1  ;;  %v741_v17 = vrot.slane %v733_v43, 2 }
  0x8e   : > { %v747_v15 = vrot.slane %v733_v43, 3  ;;  %v753_v27 = vrot.slane %v733_v43, 4  ;;  %v759_v18 = vrot.slane %v733_v43, 5  ;;  %v811_v54 = vsel %vm210_vm4, %v793_v7, %v809_v38 }
  0x8f   : > { %v701_v33 = vmax.f32 %v695_v23, %v699_v22  ;;  %v702_v16 = vmax.f32 %v696_v8, %v700_v5  ;;  %v736_v20 = vsel %vm181_vm0, %v734_v28, %v735_v49  ;;  %v737_v45 = vsel %vm181_vm0, %v735_v49, %v734_v28  ;;  %812 = vst [vmem:[%s1463_s25 + $0x1] sm:$0xf] %v811_v54 }
  0x90   : > { %v738_v46 = vmax.f32 %v732_v40, %v736_v20  ;;  %v739_v21 = vmax.f32 %v733_v43, %v737_v45  ;;  %v742_v29 = vsel %vm188_vm1, %v740_v13, %v741_v17  ;;  %v743_v10 = vsel %vm188_vm1, %v741_v17, %v740_v13 }
  0x91   : > { %v707_v48 = vmax.f32 %v701_v33, %v705_v34  ;;  %v708_v53 = vmax.f32 %v702_v16, %v706_v35  ;;  %v748_v41 = vsel %vm195_vm2, %v746_v26, %v747_v15  ;;  %v749_v57 = vsel %vm195_vm2, %v747_v15, %v746_v26 }
  0x92   : > { %v744_v58 = vmax.f32 %v738_v46, %v742_v29  ;;  %v745_v44 = vmax.f32 %v739_v21, %v743_v10  ;;  %v754_v62 = vsel %vm642_vm9, %v752_v59, %v753_v27  ;;  %v755_v55 = vsel %vm642_vm9, %v753_v27, %v752_v59 }
  0x93   : > { %v710_v42 = vrot.slane %v707_v48, 4  ;;  %v760_v56 = vsel %vm649_vm10, %v758_v51, %v759_v18  ;;  %v761_v36 = vsel %vm649_vm10, %v759_v18, %v758_v51  ;;  %v814_v11 = vrot.slane %v811_v54, 1 }
  0x94   : > { %v750_v52 = vmax.f32 %v744_v58, %v748_v41  ;;  %v751_v2 = vmax.f32 %v745_v44, %v749_v57  ;;  %v817_v14 = vrot.slane %v811_v54, 2  ;;  %v820_v32 = vrot.slane %v811_v54, 3 }
  0x95   : > { %v712_v60 = vsel %vm208_vm3, %v707_v48, %v710_v42  ;;  %v816_v30 = vmax.f32 %v811_v54, %v814_v11 }
  0x96   : > { %v713_v12 = vsel %vm210_vm4, %v712_v60, %v708_v53  ;;  %v756_v24 = vmax.f32 %v750_v52, %v754_v62  ;;  %v757_v61 = vmax.f32 %v751_v2, %v755_v55 }
  0x97   : > { %v770_v3 = vrot.slane %v713_v12, 5  ;;  %v819_v50 = vmax.f32 %v816_v30, %v817_v14 }
  0x98   : > { %v762_v6 = vmax.f32 %v756_v24, %v760_v56  ;;  %v763_v63 = vmax.f32 %v757_v61, %v761_v36 }
  0x99   : > { %v775_v25 = vsel %vm212_vm5, %v1650_v0, %v770_v3  ;;  %v822_v47 = vmax.f32 %v819_v50, %v820_v32 }
  0x9a   : > { %v765_v1 = vrot.slane %v762_v6, 4 }
  0x9b   : > { %823 = vst [vmem:[%s1463_s25] sm:$0x1] %v822_v47 }
  0x9c   : > { %v767_v9 = vsel %vm208_vm3, %v762_v6, %v765_v1 }
  0x9d   : > { %v768_v4 = vsel %vm210_vm4, %v767_v9, %v763_v63 }
  0x9e   : > { %v773_v19 = vrot.slane %v768_v4, 2 }
  0xa0   : > { %v777_v31 = vsel %vm776_vm11, %v775_v25, %v773_v19  ;;  %779 = vst [vmem:[%s1463_s25 + $0xd] sm:$0x1] %v773_v19 }
  0xa1   : > { %778 = vst [vmem:[%s1463_s25 + $0x5] sm:$0xff] %v777_v31 }
  0xa2 PF: > { %s14_s11 = sadd.s32 1, %s1156_s11   ;;  %s1730_s6 = smov %s1140_s7 }
  0xa3   : > { %p11_p9 = scmp.ge.s32.totalorder %s14_s11, 4   ;;  %s1731_s7 = smov %s1144_s8 }
  0xa4   : > { %s1732_s8 = smov %s1220_s18  ;;  %s1733_s9 = smov %s1152_s10 }
  0xa5   : > { %s1734_s10 = smov %s1736_s13  ;;  %13 = sbr.rel (!%p11_p9) target bundleno = 4 (0x4), region = 79 }
  0xac   :  { %851 = vsyncpa [#allocation3], 1 }
  0xad   :  { %853 = vsyncpa [#allocation3 + $0x1], 1 }

</bundles_post_ra>
